<compile_context>
chip_gen: v7x
topology: tpu7x:2x2x1
jax: 0.10.0
libtpu: 0.0.40
codegen_flags: <defaults>
</compile_context>

<pallas_src>
import math

import jax
import jax.numpy as jnp
from jax import lax
from jax.experimental import pallas as pl
from jax.experimental.pallas import tpu as pltpu

NEG_SLOPE = 0.1
BN_EPS = 1e-5


def _leaky(v):
    # LeakyReLU(0.1) == max(v, 0.1*v): mul+max instead of cmp+mul+select.
    return jnp.maximum(v, NEG_SLOPE * v)


# ---------------------------------------------------------------------------
# Pallas kernel: full CSPLayer forward for B images, lane-packed (B*H, W*C).
# ---------------------------------------------------------------------------
def csp_kernel(x_ref, mdn_ref, mup_ref,
               w12_ref, b12_ref, wb1_ref, bb1_ref,
               wb2_ref, bb2_ref, w3cat_ref, w3a_ref, b3_ref,
               o_ref):
    f32 = jnp.float32
    bf16 = jnp.bfloat16

    x = x_ref[...].astype(bf16)                           # (M, W*Cin) = (128, 128)

    # --- conv1 | conv2 fused: one matmul, lanes = [x1 | x2] ------------------
    x12 = _leaky(jnp.dot(x, w12_ref[...], preferred_element_type=f32)
                 + b12_ref[...])                          # (M, 2*W*Ch) f32
    x12_b = x12.astype(bf16)

    # --- Bottleneck 1x1 (zero-row-extended weight -> reads only x1 lanes) ----
    y = _leaky(jnp.dot(x12_b, wb1_ref[...], preferred_element_type=f32)
               + bb1_ref[...])                            # (M, W*Ch) f32

    # --- Bottleneck 3x3 (stride 1, pad 1) ------------------------------------
    # Horizontal taps + zero pad live in the block-banded weights wb2_ref[ky];
    # vertical taps are sublane rolls; per-image boundary masks (precomputed
    # wrapper-side) zero the wrapped rows (also across batched image borders).
    M = y.shape[0]
    # pltpu.roll requires non-negative shift: shift=M-1 is the cyclic -1.
    y_dn = (mdn_ref[...] * pltpu.roll(y, shift=1, axis=0)).astype(bf16)      # y[h-1]
    y_up = (mup_ref[...] * pltpu.roll(y, shift=M - 1, axis=0)).astype(bf16)  # y[h+1]
    acc = jnp.dot(y_dn, wb2_ref[0], preferred_element_type=f32)
    acc = acc + jnp.dot(y.astype(bf16), wb2_ref[1], preferred_element_type=f32)
    acc = acc + jnp.dot(y_up, wb2_ref[2], preferred_element_type=f32)
    y3 = _leaky(acc + bb2_ref[...]).astype(bf16)          # (M, W*Ch)

    # --- conv3 on the virtual concat [x1 + y3 | x2] (no jnp.concatenate) -----
    # (x1+y3)@w3a + x2@w3b = x12 @ [w3a; w3b] + y3 @ w3a
    out = jnp.dot(x12_b, w3cat_ref[...], preferred_element_type=f32)
    out = out + jnp.dot(y3, w3a_ref[...], preferred_element_type=f32)
    out = _leaky(out + b3_ref[...])                       # (M, W*Cout) = (128, 128)
    o_ref[...] = out.astype(o_ref.dtype)                  # full unmasked lane store


# ---------------------------------------------------------------------------
# Wrapper: lane-dense repacking of activations + weights, then pallas_call.
# ---------------------------------------------------------------------------
def _full_spec(arr):
    nd = arr.ndim
    return pl.BlockSpec(arr.shape, lambda n, _nd=nd: (0,) * _nd)


def csp_layer_pallas(x_nhwc, params, images_per_block=8):
    (w1, b1, w2, b2, wb1, bb1, wb2, bb2, w3, b3) = params
    N, H, W, Cin = x_nhwc.shape
    Ch = w1.shape[1]
    Cout = w3.shape[1]

    B = min(images_per_block, N)
    assert N % B == 0, "batch must be divisible by images_per_block"
    M = B * H                                              # matmul M dimension

    f32, bf16 = jnp.float32, jnp.bfloat16

    # ---- layout plumbing (done once, outside the kernel) --------------------
    x_packed = x_nhwc.reshape(N * H, W * Cin)              # row = n*H+h, lane = w*Cin+c
    eye_w = jnp.eye(W, dtype=f32)

    def bd(wmat):                                          # block-diagonal 1x1 conv
        return jnp.kron(eye_w, wmat)

    # conv1 | conv2 fused into one (W*Cin, 2*W*Ch) weight.
    w12_p = jnp.concatenate([bd(w1), bd(w2)], axis=1).astype(bf16)
    b12_p = jnp.concatenate([jnp.tile(b1, (1, W)), jnp.tile(b2, (1, W))], axis=1)

    # Bottleneck 1x1: zero-row-extended to (2*W*Ch, W*Ch) so it only sees x1 lanes.
    wb1_p = jnp.concatenate([bd(wb1), jnp.zeros((W * Ch, W * Ch), f32)],
                            axis=0).astype(bf16)
    bb1_p = jnp.tile(bb1, (1, W))

    # 3x3 conv: one block-tridiagonal (W*Ch, W*Ch) matrix per vertical tap ky;
    # off-diagonal blocks implement the horizontal taps incl. zero pad.
    wb2_p = jnp.stack([
        sum(jnp.kron(jnp.eye(W, k=1 - kx, dtype=f32), wb2[ky, kx])
            for kx in range(3))
        for ky in range(3)]).astype(bf16)                  # (3, W*Ch, W*Ch)
    bb2_p = jnp.tile(bb2, (1, W))

    # conv3: split + stacked -> no concat, and the x12 path is one matmul.
    w3a_p = bd(w3[:Ch])
    w3b_p = bd(w3[Ch:])
    w3cat_p = jnp.concatenate([w3a_p, w3b_p], axis=0).astype(bf16)  # (2*W*Ch, W*Cout)
    w3a_pb = w3a_p.astype(bf16)                                     # (W*Ch, W*Cout)
    b3_p = jnp.tile(b3, (1, W))

    # Per-image vertical-boundary masks (avoid in-kernel iota/cmp/select and
    # stop pltpu.roll from wrapping across batched images).
    r = jnp.arange(M)
    mask_dn = (r % H != 0).astype(f32).reshape(M, 1)       # kills h-1 at h == 0
    mask_up = (r % H != H - 1).astype(f32).reshape(M, 1)   # kills h+1 at h == H-1

    grid = (N // B,)   # keep >= 2 steps so both v7x TensorCores get work

    # NOTE: weight/bias blocks are grid-invariant; default double-buffering
    # costs < 0.3 MiB total (negligible on every generation), so we keep the
    # default pipeline_mode rather than forcing single buffering.
    grid_spec = pltpu.PrefetchScalarGridSpec(
        num_scalar_prefetch=0,
        grid=grid,
        in_specs=[
            pl.BlockSpec((M, W * Cin), lambda n: (n, 0)),
            _full_spec(mask_dn), _full_spec(mask_up),
            _full_spec(w12_p), _full_spec(b12_p),
            _full_spec(wb1_p), _full_spec(bb1_p),
            _full_spec(wb2_p), _full_spec(bb2_p),
            _full_spec(w3cat_p), _full_spec(w3a_pb), _full_spec(b3_p),
        ],
        out_specs=pl.BlockSpec((M, W * Cout), lambda n: (n, 0)),
    )
    out_packed = pl.pallas_call(
        csp_kernel,
        out_shape=jax.ShapeDtypeStruct((N * H, W * Cout), x_nhwc.dtype),
        grid_spec=grid_spec,
        compiler_params=pltpu.CompilerParams(
            dimension_semantics=("parallel",),   # B images / TC on v7x
        ),
    )(x_packed, mask_dn, mask_up, w12_p, b12_p, wb1_p, bb1_p, wb2_p, bb2_p,
      w3cat_p, w3a_pb, b3_p)
    return out_packed.reshape(N, H, W, Cout)


# ---------------------------------------------------------------------------
# Deterministic parameter construction (Conv2d bias=False + BatchNorm folded)
# ---------------------------------------------------------------------------
def make_conv_bn(key, cin, cout, k):
    kw, kg, kb, km, kv = jax.random.split(key, 5)
    fan_in = cin * k * k
    w = jax.random.normal(kw, (k, k, cin, cout), jnp.float32) / math.sqrt(fan_in)
    gamma = 1.0 + 0.1 * jax.random.normal(kg, (cout,), jnp.float32)
    beta = 0.1 * jax.random.normal(kb, (cout,), jnp.float32)
    mean = 0.1 * jax.random.normal(km, (cout,), jnp.float32)
    var = jax.random.uniform(kv, (cout,), jnp.float32, minval=0.5, maxval=1.5)
    scale = gamma / jnp.sqrt(var + BN_EPS)
    w_fold = w * scale                               # fold BN scale per out-channel
    b_fold = (beta - mean * scale).reshape(1, cout)  # folded bias
    if k == 1:
        w_fold = w_fold.reshape(cin, cout)
    return w_fold, b_fold


# ---------------------------------------------------------------------------
# Pure-JAX f32 reference (same folded params) for correctness checking
# ---------------------------------------------------------------------------
def _ref_conv1x1(x, w, b):
    y = jnp.einsum('nhwc,cd->nhwd', x, w, precision=lax.Precision.HIGHEST)
    return _leaky(y + b.reshape(1, 1, 1, -1))


def _ref_conv3x3(x, w, b):
    y = lax.conv_general_dilated(x, w, (1, 1), 'SAME',
                                 dimension_numbers=('NHWC', 'HWIO', 'NHWC'),
                                 precision=lax.Precision.HIGHEST)
    return _leaky(y + b.reshape(1, 1, 1, -1))


def csp_layer_ref(x_nhwc, params):
    (w1, b1, w2, b2, wb1, bb1, wb2, bb2, w3, b3) = params
    x1 = _ref_conv1x1(x_nhwc, w1, b1)
    y = _ref_conv1x1(x1, wb1, bb1)
    y = _ref_conv3x3(y, wb2, bb2)
    x1 = x1 + y
    x2 = _ref_conv1x1(x_nhwc, w2, b2)
    cat = jnp.concatenate([x1, x2], axis=-1)
    return _ref_conv1x1(cat, w3, b3)


# ---------------------------------------------------------------------------
if __name__ == "__main__":
    # CSPLayer(in_channels=8, out_channels=8, num_bottlenecks=1, shortcut=True)
    # TODO(synk): only num_bottlenecks=1 (the module default) is implemented and
    # BN uses eval-mode folded running stats (training-mode batch stats not done).
    N, Cin, Cout, H, W = 16, 8, 8, 16, 16     # N=16 so B=8 images/block, grid=(2,)
    Ch = int(Cout * 0.5)                      # hidden_channels = 4

    root = jax.random.PRNGKey(0)
    kx, k1, k2, kb1, kb2, k3 = jax.random.split(root, 6)

    x_nchw = jax.random.normal(kx, (N, Cin, H, W), jnp.float32)   # PyTorch layout
    x_nhwc = jnp.transpose(x_nchw, (0, 2, 3, 1))                  # kernel layout

    w1, b1 = make_conv_bn(k1, Cin, Ch, 1)         # CSPLayer.conv1
    w2, b2 = make_conv_bn(k2, Cin, Ch, 1)         # CSPLayer.conv2
    wb1, bb1 = make_conv_bn(kb1, Ch, Ch, 1)       # Bottleneck.conv1
    wb2, bb2 = make_conv_bn(kb2, Ch, Ch, 3)       # Bottleneck.conv2 (3x3, pad 1)
    w3, b3 = make_conv_bn(k3, 2 * Ch, Cout, 1)    # CSPLayer.conv3
    params = (w1, b1, w2, b2, wb1, bb1, wb2, bb2, w3, b3)

    out = csp_layer_pallas(x_nhwc, params, images_per_block=8)
    out = jax.block_until_ready(out)

    ref = csp_layer_ref(x_nhwc, params)
    err = float(jnp.max(jnp.abs(out - ref)))
    assert out.shape == (N, H, W, Cout), out.shape
    # bf16 MXU operands (per perf review) vs f32-HIGHEST reference -> loose
    # tolerance; structural bugs would give O(1) errors.
    assert err < 5e-2, f"max abs err {err}"

    print("KERNEL_OK")
</pallas_src>

<mosaic_0001>
module attributes {stable_mosaic.version = 11 : i64} {
  func.func @csp_kernel(%arg0: i32, %arg1: memref<128x128xf32, #tpu.memory_space<vmem>>, %arg2: memref<128x1xf32, #tpu.memory_space<vmem>>, %arg3: memref<128x1xf32, #tpu.memory_space<vmem>>, %arg4: memref<128x128xbf16, #tpu.memory_space<vmem>>, %arg5: memref<1x128xf32, #tpu.memory_space<vmem>>, %arg6: memref<128x64xbf16, #tpu.memory_space<vmem>>, %arg7: memref<1x64xf32, #tpu.memory_space<vmem>>, %arg8: memref<3x64x64xbf16, #tpu.memory_space<vmem>>, %arg9: memref<1x64xf32, #tpu.memory_space<vmem>>, %arg10: memref<128x128xbf16, #tpu.memory_space<vmem>>, %arg11: memref<64x128xbf16, #tpu.memory_space<vmem>>, %arg12: memref<1x128xf32, #tpu.memory_space<vmem>>, %arg13: memref<128x128xf32, #tpu.memory_space<vmem>>) attributes {dimension_semantics = [#tpu.dimension_semantics<parallel>], iteration_bounds = array<i64: 2>, scalar_prefetch = 0 : i64, scratch_operands = 0 : i64, tpu.core_type = #tpu.core_type<tc>, window_params = [{transform_indices = @transform_0, window_bounds = array<i64: 128, 128>}, {pipeline_mode = #tpu.pipeline_mode<synchronous>, transform_indices = @transform_1, window_bounds = array<i64: 128, 1>}, {pipeline_mode = #tpu.pipeline_mode<synchronous>, transform_indices = @transform_2, window_bounds = array<i64: 128, 1>}, {pipeline_mode = #tpu.pipeline_mode<synchronous>, transform_indices = @transform_3, window_bounds = array<i64: 128, 128>}, {pipeline_mode = #tpu.pipeline_mode<synchronous>, transform_indices = @transform_4, window_bounds = array<i64: 1, 128>}, {pipeline_mode = #tpu.pipeline_mode<synchronous>, transform_indices = @transform_5, window_bounds = array<i64: 128, 64>}, {pipeline_mode = #tpu.pipeline_mode<synchronous>, transform_indices = @transform_6, window_bounds = array<i64: 1, 64>}, {pipeline_mode = #tpu.pipeline_mode<synchronous>, transform_indices = @transform_7, window_bounds = array<i64: 3, 64, 64>}, {pipeline_mode = #tpu.pipeline_mode<synchronous>, transform_indices = @transform_8, window_bounds = array<i64: 1, 64>}, {pipeline_mode = #tpu.pipeline_mode<synchronous>, transform_indices = @transform_9, window_bounds = array<i64: 128, 128>}, {pipeline_mode = #tpu.pipeline_mode<synchronous>, transform_indices = @transform_10, window_bounds = array<i64: 64, 128>}, {pipeline_mode = #tpu.pipeline_mode<synchronous>, transform_indices = @transform_11, window_bounds = array<i64: 1, 128>}, {transform_indices = @transform_12, window_bounds = array<i64: 128, 128>}]} {
    %c0 = arith.constant 0 : index
    %c0_0 = arith.constant 0 : index
    %0 = vector.load %arg1[%c0, %c0_0] : memref<128x128xf32, #tpu.memory_space<vmem>>, vector<128x128xf32>
    %1 = arith.truncf %0 : vector<128x128xf32> to vector<128x128xbf16>
    %c0_1 = arith.constant 0 : index
    %c0_2 = arith.constant 0 : index
    %2 = vector.load %arg4[%c0_1, %c0_2] : memref<128x128xbf16, #tpu.memory_space<vmem>>, vector<128x128xbf16>
    %cst = arith.constant dense<0.000000e+00> : vector<128x128xf32>
    %3 = tpu.matmul %1, %2, %cst {dimension_numbers = #tpu.dot_dimension_numbers<[1], [0], [0], [1], [0, 0, 1, 1], [], []>} : vector<128x128xbf16>, vector<128x128xbf16>, vector<128x128xf32> -> vector<128x128xf32>
    %c0_3 = arith.constant 0 : index
    %c0_4 = arith.constant 0 : index
    %4 = vector.load %arg5[%c0_3, %c0_4] : memref<1x128xf32, #tpu.memory_space<vmem>>, vector<1x128xf32>
    %5 = vector.broadcast %4 : vector<1x128xf32> to vector<128x128xf32>
    %6 = arith.addf %3, %5 : vector<128x128xf32>
    %cst_5 = arith.constant 1.000000e-01 : f32
    %7 = vector.broadcast %cst_5 : f32 to vector<128x128xf32>
    %8 = arith.mulf %7, %6 : vector<128x128xf32>
    %9 = arith.maximumf %6, %8 : vector<128x128xf32>
    %10 = arith.truncf %9 : vector<128x128xf32> to vector<128x128xbf16>
    %c0_6 = arith.constant 0 : index
    %c0_7 = arith.constant 0 : index
    %11 = vector.load %arg6[%c0_6, %c0_7] : memref<128x64xbf16, #tpu.memory_space<vmem>>, vector<128x64xbf16>
    %cst_8 = arith.constant dense<0.000000e+00> : vector<128x64xf32>
    %12 = tpu.matmul %10, %11, %cst_8 {dimension_numbers = #tpu.dot_dimension_numbers<[1], [0], [0], [1], [0, 0, 1, 1], [], []>} : vector<128x128xbf16>, vector<128x64xbf16>, vector<128x64xf32> -> vector<128x64xf32>
    %c0_9 = arith.constant 0 : index
    %c0_10 = arith.constant 0 : index
    %13 = vector.load %arg7[%c0_9, %c0_10] : memref<1x64xf32, #tpu.memory_space<vmem>>, vector<1x64xf32>
    %14 = vector.broadcast %13 : vector<1x64xf32> to vector<128x64xf32>
    %15 = arith.addf %12, %14 : vector<128x64xf32>
    %cst_11 = arith.constant 1.000000e-01 : f32
    %16 = vector.broadcast %cst_11 : f32 to vector<128x64xf32>
    %17 = arith.mulf %16, %15 : vector<128x64xf32>
    %18 = arith.maximumf %15, %17 : vector<128x64xf32>
    %c0_12 = arith.constant 0 : index
    %c0_13 = arith.constant 0 : index
    %19 = vector.load %arg2[%c0_12, %c0_13] : memref<128x1xf32, #tpu.memory_space<vmem>>, vector<128x1xf32>
    %c1_i32 = arith.constant 1 : i32
    %20 = tpu.dynamic_rotate %18 by %c1_i32 dim 0 : vector<128x64xf32>, i32 -> vector<128x64xf32>
    %21 = vector.broadcast %19 : vector<128x1xf32> to vector<128x64xf32>
    %22 = arith.mulf %21, %20 : vector<128x64xf32>
    %23 = arith.truncf %22 : vector<128x64xf32> to vector<128x64xbf16>
    %c0_14 = arith.constant 0 : index
    %c0_15 = arith.constant 0 : index
    %24 = vector.load %arg3[%c0_14, %c0_15] : memref<128x1xf32, #tpu.memory_space<vmem>>, vector<128x1xf32>
    %c127_i32 = arith.constant 127 : i32
    %25 = tpu.dynamic_rotate %18 by %c127_i32 dim 0 : vector<128x64xf32>, i32 -> vector<128x64xf32>
    %26 = vector.broadcast %24 : vector<128x1xf32> to vector<128x64xf32>
    %27 = arith.mulf %26, %25 : vector<128x64xf32>
    %28 = arith.truncf %27 : vector<128x64xf32> to vector<128x64xbf16>
    %c0_16 = arith.constant 0 : index
    %c0_17 = arith.constant 0 : index
    %c0_18 = arith.constant 0 : index
    %29 = vector.load %arg8[%c0_16, %c0_17, %c0_18] : memref<3x64x64xbf16, #tpu.memory_space<vmem>>, vector<1x64x64xbf16>
    %30 = vector.shape_cast %29 : vector<1x64x64xbf16> to vector<64x64xbf16>
    %cst_19 = arith.constant dense<0.000000e+00> : vector<128x64xf32>
    %31 = tpu.matmul %23, %30, %cst_19 {dimension_numbers = #tpu.dot_dimension_numbers<[1], [0], [0], [1], [0, 0, 1, 1], [], []>} : vector<128x64xbf16>, vector<64x64xbf16>, vector<128x64xf32> -> vector<128x64xf32>
    %32 = arith.truncf %18 : vector<128x64xf32> to vector<128x64xbf16>
    %c1 = arith.constant 1 : index
    %c0_20 = arith.constant 0 : index
    %c0_21 = arith.constant 0 : index
    %33 = vector.load %arg8[%c1, %c0_20, %c0_21] : memref<3x64x64xbf16, #tpu.memory_space<vmem>>, vector<1x64x64xbf16>
    %34 = vector.shape_cast %33 : vector<1x64x64xbf16> to vector<64x64xbf16>
    %cst_22 = arith.constant dense<0.000000e+00> : vector<128x64xf32>
    %35 = tpu.matmul %32, %34, %cst_22 {dimension_numbers = #tpu.dot_dimension_numbers<[1], [0], [0], [1], [0, 0, 1, 1], [], []>} : vector<128x64xbf16>, vector<64x64xbf16>, vector<128x64xf32> -> vector<128x64xf32>
    %36 = arith.addf %31, %35 : vector<128x64xf32>
    %c2 = arith.constant 2 : index
    %c0_23 = arith.constant 0 : index
    %c0_24 = arith.constant 0 : index
    %37 = vector.load %arg8[%c2, %c0_23, %c0_24] : memref<3x64x64xbf16, #tpu.memory_space<vmem>>, vector<1x64x64xbf16>
    %38 = vector.shape_cast %37 : vector<1x64x64xbf16> to vector<64x64xbf16>
    %cst_25 = arith.constant dense<0.000000e+00> : vector<128x64xf32>
    %39 = tpu.matmul %28, %38, %cst_25 {dimension_numbers = #tpu.dot_dimension_numbers<[1], [0], [0], [1], [0, 0, 1, 1], [], []>} : vector<128x64xbf16>, vector<64x64xbf16>, vector<128x64xf32> -> vector<128x64xf32>
    %40 = arith.addf %36, %39 : vector<128x64xf32>
    %c0_26 = arith.constant 0 : index
    %c0_27 = arith.constant 0 : index
    %41 = vector.load %arg9[%c0_26, %c0_27] : memref<1x64xf32, #tpu.memory_space<vmem>>, vector<1x64xf32>
    %42 = vector.broadcast %41 : vector<1x64xf32> to vector<128x64xf32>
    %43 = arith.addf %40, %42 : vector<128x64xf32>
    %cst_28 = arith.constant 1.000000e-01 : f32
    %44 = vector.broadcast %cst_28 : f32 to vector<128x64xf32>
    %45 = arith.mulf %44, %43 : vector<128x64xf32>
    %46 = arith.maximumf %43, %45 : vector<128x64xf32>
    %47 = arith.truncf %46 : vector<128x64xf32> to vector<128x64xbf16>
    %c0_29 = arith.constant 0 : index
    %c0_30 = arith.constant 0 : index
    %48 = vector.load %arg10[%c0_29, %c0_30] : memref<128x128xbf16, #tpu.memory_space<vmem>>, vector<128x128xbf16>
    %cst_31 = arith.constant dense<0.000000e+00> : vector<128x128xf32>
    %49 = tpu.matmul %10, %48, %cst_31 {dimension_numbers = #tpu.dot_dimension_numbers<[1], [0], [0], [1], [0, 0, 1, 1], [], []>} : vector<128x128xbf16>, vector<128x128xbf16>, vector<128x128xf32> -> vector<128x128xf32>
    %c0_32 = arith.constant 0 : index
    %c0_33 = arith.constant 0 : index
    %50 = vector.load %arg11[%c0_32, %c0_33] : memref<64x128xbf16, #tpu.memory_space<vmem>>, vector<64x128xbf16>
    %cst_34 = arith.constant dense<0.000000e+00> : vector<128x128xf32>
    %51 = tpu.matmul %47, %50, %cst_34 {dimension_numbers = #tpu.dot_dimension_numbers<[1], [0], [0], [1], [0, 0, 1, 1], [], []>} : vector<128x64xbf16>, vector<64x128xbf16>, vector<128x128xf32> -> vector<128x128xf32>
    %52 = arith.addf %49, %51 : vector<128x128xf32>
    %c0_35 = arith.constant 0 : index
    %c0_36 = arith.constant 0 : index
    %53 = vector.load %arg12[%c0_35, %c0_36] : memref<1x128xf32, #tpu.memory_space<vmem>>, vector<1x128xf32>
    %54 = vector.broadcast %53 : vector<1x128xf32> to vector<128x128xf32>
    %55 = arith.addf %52, %54 : vector<128x128xf32>
    %cst_37 = arith.constant 1.000000e-01 : f32
    %56 = vector.broadcast %cst_37 : f32 to vector<128x128xf32>
    %57 = arith.mulf %56, %55 : vector<128x128xf32>
    %58 = arith.maximumf %55, %57 : vector<128x128xf32>
    %c0_38 = arith.constant 0 : index
    %c0_39 = arith.constant 0 : index
    %59 = vector.load %arg13[%c0_38, %c0_39] : memref<128x128xf32, #tpu.memory_space<vmem>>, vector<128x128xf32>
    tpu.vector_store %arg13[%c0_38, %c0_39], %58 {strides = array<i32>} : memref<128x128xf32, #tpu.memory_space<vmem>>, vector<128x128xf32>,
    return
  }
  func.func @transform_0(%arg0: i32) -> (i32, i32) {
    %c0_i32 = arith.constant 0 : i32
    %c0_i32_0 = arith.constant 0 : i32
    return %arg0, %c0_i32 : i32, i32
  }
  func.func @transform_1(%arg0: i32) -> (i32, i32) {
    %c0_i32 = arith.constant 0 : i32
    %c0_i32_0 = arith.constant 0 : i32
    %c0_i32_1 = arith.constant 0 : i32
    return %c0_i32, %c0_i32_0 : i32, i32
  }
  func.func @transform_2(%arg0: i32) -> (i32, i32) {
    %c0_i32 = arith.constant 0 : i32
    %c0_i32_0 = arith.constant 0 : i32
    %c0_i32_1 = arith.constant 0 : i32
    return %c0_i32, %c0_i32_0 : i32, i32
  }
  func.func @transform_3(%arg0: i32) -> (i32, i32) {
    %c0_i32 = arith.constant 0 : i32
    %c0_i32_0 = arith.constant 0 : i32
    %c0_i32_1 = arith.constant 0 : i32
    return %c0_i32, %c0_i32_0 : i32, i32
  }
  func.func @transform_4(%arg0: i32) -> (i32, i32) {
    %c0_i32 = arith.constant 0 : i32
    %c0_i32_0 = arith.constant 0 : i32
    %c0_i32_1 = arith.constant 0 : i32
    return %c0_i32, %c0_i32_0 : i32, i32
  }
  func.func @transform_5(%arg0: i32) -> (i32, i32) {
    %c0_i32 = arith.constant 0 : i32
    %c0_i32_0 = arith.constant 0 : i32
    %c0_i32_1 = arith.constant 0 : i32
    return %c0_i32, %c0_i32_0 : i32, i32
  }
  func.func @transform_6(%arg0: i32) -> (i32, i32) {
    %c0_i32 = arith.constant 0 : i32
    %c0_i32_0 = arith.constant 0 : i32
    %c0_i32_1 = arith.constant 0 : i32
    return %c0_i32, %c0_i32_0 : i32, i32
  }
  func.func @transform_7(%arg0: i32) -> (i32, i32, i32) {
    %c0_i32 = arith.constant 0 : i32
    %c0_i32_0 = arith.constant 0 : i32
    %c0_i32_1 = arith.constant 0 : i32
    %c0_i32_2 = arith.constant 0 : i32
    return %c0_i32, %c0_i32_0, %c0_i32_1 : i32, i32, i32
  }
  func.func @transform_8(%arg0: i32) -> (i32, i32) {
    %c0_i32 = arith.constant 0 : i32
    %c0_i32_0 = arith.constant 0 : i32
    %c0_i32_1 = arith.constant 0 : i32
    return %c0_i32, %c0_i32_0 : i32, i32
  }
  func.func @transform_9(%arg0: i32) -> (i32, i32) {
    %c0_i32 = arith.constant 0 : i32
    %c0_i32_0 = arith.constant 0 : i32
    %c0_i32_1 = arith.constant 0 : i32
    return %c0_i32, %c0_i32_0 : i32, i32
  }
  func.func @transform_10(%arg0: i32) -> (i32, i32) {
    %c0_i32 = arith.constant 0 : i32
    %c0_i32_0 = arith.constant 0 : i32
    %c0_i32_1 = arith.constant 0 : i32
    return %c0_i32, %c0_i32_0 : i32, i32
  }
  func.func @transform_11(%arg0: i32) -> (i32, i32) {
    %c0_i32 = arith.constant 0 : i32
    %c0_i32_0 = arith.constant 0 : i32
    %c0_i32_1 = arith.constant 0 : i32
    return %c0_i32, %c0_i32_0 : i32, i32
  }
  func.func @transform_12(%arg0: i32) -> (i32, i32) {
    %c0_i32 = arith.constant 0 : i32
    %c0_i32_0 = arith.constant 0 : i32
    return %arg0, %c0_i32 : i32, i32
  }
}

</mosaic_0001>

<bundles_post_ra>
// kernel: tpu_custom_call.1
= control target key start
LH: loop header
LB: loop body
LE: loop exit
PB: predicated region body
PF: predicated region fallthrough
CT: control target
= control target key end

     0   :  { %s4101_s0 = inlined_call_operand.vmem [shape: f32[256,128], index: 0, kind: input, shape index: {}]   ;;  %s4102_s1 = inlined_call_operand.vmem [shape: f32[128,1], index: 1, kind: input, shape index: {}]   ;;  %s4103_s2 = inlined_call_operand.vmem [shape: f32[128,1], index: 2, kind: input, shape index: {}]   ;;  %s4104_s3 = inlined_call_operand.hbm [shape: bf16[128,128], index: 3, kind: input, shape index: {}]   ;;  %s4105_s4 = inlined_call_operand.hbm [shape: f32[1,128], index: 4, kind: input, shape index: {}]   ;;  %s4106_s5 = inlined_call_operand.vmem [shape: bf16[128,64], index: 5, kind: input, shape index: {}]   ;;  %s4107_s6 = inlined_call_operand.hbm [shape: f32[1,64], index: 6, kind: input, shape index: {}]   ;;  %s4108_s7 = inlined_call_operand.vmem [shape: bf16[3,64,64], index: 7, kind: input, shape index: {}]   ;;  %s4109_s8 = inlined_call_operand.hbm [shape: f32[1,64], index: 8, kind: input, shape index: {}]   ;;  %s4110_s9 = inlined_call_operand.hbm [shape: bf16[128,128], index: 9, kind: input, shape index: {}]   ;;  %s4111_s10 = inlined_call_operand.vmem [shape: bf16[64,128], index: 10, kind: input, shape index: {}]   ;;  %s4112_s11 = inlined_call_operand.vmem [shape: f32[1,128], index: 11, kind: input, shape index: {}]   ;;  %s4113_s12 = inlined_call_operand.hbm [shape: f32[256,128], index: 12, kind: output, shape index: {}]  }
   0x1   :  { %4139 = sst [smem:[#allocation31_spill]] %s4105_s4 }
   0x2   :  { %4140 = sst [smem:[#allocation32_spill]] %s4109_s8 }
   0x3   :  { %4141 = sst [smem:[#allocation33_spill]] %s4113_s12 }
   0x4   :  { %17 = vsyncpa [#allocation3], 0 }
   0x5   :  { %18 = vsyncpa [#allocation6], 0 }
   0x6   :  { %19 = vsyncpa [#allocation9], 0 }
   0x7   :  { %20 = vsyncpa [#allocation4], 0 }
   0x8   :  { %22 = vsyncpa [#allocation4 + $0x1], 0  ;;  %s3171_s21 = smov 0   ;;  %s3173_s22 = smov 0  }
   0x9   :  { %s3175_s23 = smov 0   ;;  %s3177_s24 = smov 0  }
   0xa LB: > { %4142 = sst [smem:[#allocation16_spill]] %s3081_s21  ;;  %s3192_s25 = sadd.s32 4294967295, %s3093_s24   ;;  %s3093_s24 = sphi %s3177_s24, %s4212_s24   ;;  %s3089_s23 = sphi %s3175_s23, %s4214_s23   ;;  %s3085_s22 = sphi %s3173_s22, %s4216_s22   ;;  %s3081_s21 = sphi %s3171_s21, %s4215_s21  }
   0xb   : > { %4143 = sst [smem:[#allocation17_spill]] %s3089_s23  ;;  %s2283_s26 = sadd.s32 4294967294, %s3093_s24  }
   0xc   : > { %4144 = sst [smem:[#allocation18_spill]] %s3093_s24  ;;  %s3196_s27 = sadd.s32 1, %s3093_s24  }
   0xd   : > { %4145 = sst [smem:[#allocation19_spill]] %s3196_s27  ;;  %s292_s28 = sadd.s32 1, %s3089_s23 }
   0xe   : > { %s289_s29 = ssub.s32 %s3093_s24, %s3196_s27  ;;  %p302_p0 = scmp.ne.s32.totalorder %s3089_s23, %s3085_s22 }
   0xf   : > { %p290_p1 = scmp.eq.s32.totalorder %s289_s29, 0  ;;  %p303_p2 = scmp.eq.s32.totalorder %s3192_s25, 1 }
  0x10   : > { %p308_p3 = scmp.ne.s32.totalorder %s3085_s22, %s3081_s21  ;;  %p309_p4 = scmp.eq.s32.totalorder %s2283_s26, 1 }
  0x11   : > { %s3207_s30 = scalar_select %p290_p1, %s3089_s23, %s292_s28  }
  0x12   : > { %p3209_p5 = por %p303_p2, %p302_p0  ;;  %p3213_p6 = por %p309_p4, %p308_p3 }
  0x13   : > { %4146 = sst [smem:[#allocation20_spill]] %s3207_s30  ;;  %p2284_p7 = scmp.ge.s32.totalorder %s3093_s24, 1 }
  0x14   : > { %s4147_s13 = scalar_select %p3209_p5, 1, 0 }
  0x15   : > { %s4149_s14 = scalar_select %p3213_p6, 1, 0 }
  0x16   : > { %4148 = sst [smem:[#allocation21_spill]] %s4147_s13  ;;  %p316_p8 = scmp.lt.s32.totalorder %s3093_s24, 3 }
  0x17   : > { %4150 = sst [smem:[#allocation22_spill]] %s4149_s14  ;;  %p4118_p9 = scmp.eq.s32.totalorder %s3192_s25, 0 }
  0x18   : > { %p3220_p10 = pnand %p2284_p7, %p316_p8  ;;  %s3095_s16 = smov [#allocation5]  }
  0x19   : > { %s348_s17 = sshll.u32 %s3095_s16, 4  ;;  %s3096_s18 = smov [#allocation8]   ;;  %s349_s17 = int_to_ptr.vmem [resolvable:$true] %s348_s17 }
  0x1a   : > { %s4151_s15 = scalar_select %p3220_p10, 1, 0 }
  0x1b   : > { %p2764_p11 = pneg %p3220_p10  ;;  %s376_s19 = sshll.u32 %s3096_s18, 4  ;;  %s3232_s19 = int_to_ptr.vmem [resolvable:$true] %s376_s19 }
  0x1c   : > { %s3097_s26 = smov [#allocation2]   ;;  %s4153_s4 = sld [smem:[#allocation31_spill]] }
  0x1d   : > { %p3228_p12 = pnand %p4118_p9, %p2764_p11  ;;  %s334_s28 = sshll.u32 %s3097_s26, 4  ;;  %s3234_s28 = int_to_ptr.vmem [resolvable:$true] %s334_s28 }
  0x1f   : > { %p3244_p0 = pneg %p3228_p12 }
  0x22   : > { %s2879_s16 = scalar_lea.hbm %s4153_s4, 16 }
  0x23   : > { %p2880_p13 = scmp.ne.s32.totalorder %s4153_s4, %s2879_s16  ;;  %p2886_p3 = scmp.lt.u32.totalorder %s2879_s16, %s4153_s4 }
  0x25   : > { %p2882_p1 = pnand %p3244_p0, %p2880_p13 }
  0x27   : > { %p2883_p2 = pneg %p2882_p1 }
  0x29   : > { %p2888_p4 = pnand %p2886_p3, %p2883_p2 }
  0x2b   : > { %2891 = shalt.err (!%p2888_p4)
}
  0x2c   : > { %s2892_s30 = scalar_lea.vmem %s349_s17, 16  ;;  %s2899_s23 = scalar_lea.vmem %s349_s17, 32 }
  0x2d   : > { %p2893_p7 = scmp.ne.s32.totalorder %s349_s17, %s2892_s30  ;;  %p2900_p9 = scmp.lt.s32.totalorder %s349_s17, %s349_s17 }
  0x2e   : > { %p2901_p6 = scmp.lt.s32.totalorder %s2899_s23, %s2892_s30 }
  0x2f   : > { %p2895_p8 = pnand %p2893_p7, %p3244_p0 }
  0x30   : > { %p2902_p5 = por %p2901_p6, %p2900_p9 }
  0x31   : > { %p2896_p11 = pneg %p2895_p8 }
  0x33   : > { %p2903_p10 = pnand %p2902_p5, %p2896_p11 }
  0x35   : > { %2906 = shalt.err (!%p2903_p10)
}
  0x36   : > { %2770 = dma.hbm_to_vmem [thread:$0]  (!%p3228_p12), %s4153_s4, 16, %s349_s17, [#allocation6]  }
  0x37   : > { %s4155_s8 = sld [smem:[#allocation32_spill]] }
  0x3d   : > { %s2907_s26 = scalar_lea.hbm %s4155_s8, 16 }
  0x3e   : > { %p2908_p13 = scmp.ne.s32.totalorder %s4155_s8, %s2907_s26  ;;  %p2914_p5 = scmp.lt.u32.totalorder %s2907_s26, %s4155_s8 }
  0x40   : > { %p2910_p1 = pnand %p2908_p13, %p3244_p0 }
  0x42   : > { %p2911_p6 = pneg %p2910_p1 }
  0x44   : > { %p2916_p9 = pnand %p2914_p5, %p2911_p6 }
  0x46   : > { %2919 = shalt.err (!%p2916_p9)
}
  0x47   : > { %s2920_s17 = scalar_lea.vmem %s3232_s19, 16  ;;  %s2927_s21 = scalar_lea.vmem %s3232_s19, 32 }
  0x48   : > { %p2921_p10 = scmp.ne.s32.totalorder %s3232_s19, %s2920_s17  ;;  %p2928_p4 = scmp.lt.s32.totalorder %s3232_s19, %s3232_s19 }
  0x49   : > { %p2929_p7 = scmp.lt.s32.totalorder %s2927_s21, %s2920_s17 }
  0x4a   : > { %p2923_p2 = pnand %p2921_p10, %p3244_p0 }
  0x4b   : > { %p2930_p8 = por %p2929_p7, %p2928_p4 }
  0x4c   : > { %p2924_p3 = pneg %p2923_p2 }
  0x4e   : > { %p2931_p11 = pnand %p2930_p8, %p2924_p3 }
  0x50   : > { %2934 = shalt.err (!%p2931_p11)
}
  0x51   : > { %2776 = dma.hbm_to_vmem [thread:$0]  (!%p3228_p12), %s4155_s8, 16, %s3232_s19, [#allocation9]  }
  0x52   : > { %s2935_s16 = scalar_lea.hbm %s4104_s3, 1024 }
  0x53   : > { %p2936_p13 = scmp.ne.s32.totalorder %s4104_s3, %s2935_s16  ;;  %p2942_p5 = scmp.lt.u32.totalorder %s2935_s16, %s4104_s3 }
  0x55   : > { %p2938_p1 = pnand %p2936_p13, %p3244_p0 }
  0x57   : > { %p2939_p6 = pneg %p2938_p1 }
  0x59   : > { %p2944_p9 = pnand %p2942_p5, %p2939_p6 }
  0x5b   : > { %2947 = shalt.err (!%p2944_p9)
}
  0x5c   : > { %s2948_s19 = scalar_lea.vmem %s3234_s28, 1024  ;;  %p2956_p4 = scmp.lt.s32.totalorder %s3234_s28, %s3234_s28 }
  0x5d   : > { %p2949_p10 = scmp.ne.s32.totalorder %s3234_s28, %s2948_s19  ;;  %p2957_p7 = scmp.lt.s32.totalorder %s2948_s19, %s2948_s19 }
  0x5f   : > { %p2951_p2 = pnand %p2949_p10, %p3244_p0  ;;  %p2958_p8 = por %p2957_p7, %p2956_p4 }
  0x61   : > { %p2952_p3 = pneg %p2951_p2 }
  0x63   : > { %p2959_p11 = pnand %p2958_p8, %p2952_p3 }
  0x65   : > { %2962 = shalt.err (!%p2959_p11)
}
  0x66   : > { %s3098_s21 = smov 64   ;;  %s3099_s24 = smov 4  }
  0x67   : > { %2767 = dma.hbm_to_vmem [thread:$0]  (!%p3228_p12), %s4104_s3, 1024, %s3234_s28, [#allocation3], %s3098_s21, %s3098_s21, %s3099_s24  }
  0x68   : > { %s3100_s14 = smov [#allocation7]   ;;  %s3101_s26 = smov [#allocation10]  }
  0x69   : > { %s362_s16 = sshll.u32 %s3100_s14, 4  ;;  %s386_s30 = sshll.u32 %s3101_s26, 4  ;;  %s363_s16 = int_to_ptr.vmem [resolvable:$true] %s362_s16  ;;  %s387_s30 = int_to_ptr.vmem [resolvable:$true] %s386_s30 }
  0x6a   : > { %s2963_s19 = scalar_lea.hbm %s4107_s6, 16 }
  0x6b   : > { %p2964_p13 = scmp.ne.s32.totalorder %s4107_s6, %s2963_s19  ;;  %p2970_p5 = scmp.lt.u32.totalorder %s2963_s19, %s4107_s6 }
  0x6d   : > { %p2966_p1 = pnand %p2964_p13, %p3244_p0 }
  0x6f   : > { %p2967_p6 = pneg %p2966_p1 }
  0x71   : > { %p2972_p9 = pnand %p2970_p5, %p2967_p6 }
  0x73   : > { %2975 = shalt.err (!%p2972_p9)
}
  0x74   : > { %s2976_s28 = scalar_lea.vmem %s363_s16, 16  ;;  %s2983_s27 = scalar_lea.vmem %s363_s16, 32 }
  0x75   : > { %p2977_p10 = scmp.ne.s32.totalorder %s363_s16, %s2976_s28  ;;  %p2984_p4 = scmp.lt.s32.totalorder %s363_s16, %s363_s16 }
  0x76   : > { %p2985_p7 = scmp.lt.s32.totalorder %s2983_s27, %s2976_s28 }
  0x77   : > { %p2979_p2 = pnand %p2977_p10, %p3244_p0 }
  0x78   : > { %p2986_p8 = por %p2985_p7, %p2984_p4 }
  0x79   : > { %p2980_p3 = pneg %p2979_p2 }
  0x7b   : > { %p2987_p11 = pnand %p2986_p8, %p2980_p3 }
  0x7d   : > { %2990 = shalt.err (!%p2987_p11)
}
  0x7e   : > { %2773 = dma.hbm_to_vmem [thread:$0]  (!%p3228_p12), %s4107_s6, 16, %s363_s16, [#allocation6]  }
  0x7f   : > { %s2991_s29 = scalar_lea.hbm %s4110_s9, 1024 }
  0x80   : > { %p2992_p13 = scmp.ne.s32.totalorder %s4110_s9, %s2991_s29  ;;  %p2998_p5 = scmp.lt.u32.totalorder %s2991_s29, %s4110_s9 }
  0x82   : > { %p2994_p1 = pnand %p2992_p13, %p3244_p0 }
  0x84   : > { %p2995_p6 = pneg %p2994_p1 }
  0x86   : > { %p3000_p9 = pnand %p2998_p5, %p2995_p6 }
  0x88   : > { %3003 = shalt.err (!%p3000_p9)
}
  0x89   : > { %s3004_s19 = scalar_lea.vmem %s387_s30, 1024  ;;  %p3012_p4 = scmp.lt.s32.totalorder %s387_s30, %s387_s30 }
  0x8a   : > { %p3005_p10 = scmp.ne.s32.totalorder %s387_s30, %s3004_s19  ;;  %p3013_p7 = scmp.lt.s32.totalorder %s3004_s19, %s3004_s19 }
  0x8c   : > { %p3007_p2 = pnand %p3005_p10, %p3244_p0  ;;  %p3014_p8 = por %p3013_p7, %p3012_p4 }
  0x8e   : > { %p3008_p3 = pneg %p3007_p2 }
  0x90   : > { %p3015_p11 = pnand %p3014_p8, %p3008_p3 }
  0x92   : > { %3018 = shalt.err (!%p3015_p11)
}
  0x93   : > { %2779 = dma.hbm_to_vmem [thread:$0]  (!%p3228_p12), %s4110_s9, 1024, %s387_s30, [#allocation9], %s3098_s21, %s3098_s21, %s3099_s24  }
  0x94   : > { %p4156_p13 = scmp.ne.s32.totalorder %s4151_s15, 0 }
  0x96   : > { %417 = sbr.rel (%p4156_p13) target bundleno = 1233 (0x4d1), region = 68 }
  0x9d   : > { %p4157_p0 = scmp.eq.s32.totalorder %s3192_s25, 0 }
  0x9f   : > { %3064 = dma.done.wait (%p4157_p0), [#allocation3], 1024   ;;  %p4158_p1 = pmov %p4157_p0 }
  0xa0   : > { %p4159_p6 = pmov %p4157_p0 }
  0xa1   : > { %3066 = vsyncadd (%p4158_p1), [#allocation3], 4294966272 }
  0xa2   : > { %3068 = dma.done.wait (%p4159_p6), [#allocation6], 32   ;;  %p4160_p5 = pmov %p4157_p0 }
  0xa3   : > { %p4161_p9 = pmov %p4157_p0 }
  0xa4   : > { %3070 = vsyncadd (%p4160_p5), [#allocation6], 4294967264 }
  0xa5   : > { %3072 = dma.done.wait (%p4161_p9), [#allocation9], 1040   ;;  %p4162_p12 = pmov %p4157_p0 }
  0xa6   : > { %s2298_s15 = sshll.u32 %s3192_s25, 4  ;;  %v2839_v0 = vld [vmem:[#allocation2] sm:$0xff]   ;;  %v2840_v1 = vld [vmem:[#allocation2 + $0x8] sm:$0xff]   ;;  %v2841_v2 = vld [vmem:[#allocation2 + $0x10] sm:$0xff]   ;;  %v3102_v42 = vmov 0   ;;  %vm1272_vm2 = vcmask 523264  }
  0xa7   : > { %3074 = vsyncadd (%p4162_p12), [#allocation9], 4294966256  ;;  %p476_p10 = scmp.lt.s32.totalorder %s2298_s15, 31  ;;  %2494 = vmatprep.subr.bf16.mxu0 %v2839_v0  ;;  %v2842_v3 = vld [vmem:[#allocation2 + $0x18] sm:$0xff]   ;;  %v2843_v7 = vld [vmem:[#allocation2 + $0x20] sm:$0xff]   ;;  %2837 = vset.pattern.permute.xlu0 %v3102_v42  ;;  %s472_s21 = sand.u32 1, %s3085_s22  }
  0xa8   : > { %2495 = vmatpush3.bf16.msra.mxu0 %v2839_v0  ;;  %v2847_v8 = vld [vmem:[%s4106_s5] sm:$0xff]   ;;  %v2848_v9 = vld [vmem:[%s4106_s5 + $0x8] sm:$0xff]   ;;  %v2845_v11 = vld [vmem:[#allocation2 + $0x30] sm:$0xff]   ;;  %2838 = vset.pattern.permute.xlu1 %v3102_v42  ;;  %s2297_s27 = sshll.u32 %s472_s21, 7  ;;  %s2397_s8 = sshll.u32 %s3192_s25, 11 }
  0xa9   : > { %s4218_s15 = smov (!%p476_p10, %s2298_s15), 31  ;;  %2496 = vmatprep.subr.bf16.mxu0 %v2840_v1  ;;  %v2844_v10 = vld [vmem:[#allocation2 + $0x28] sm:$0xff]   ;;  %2526 = vmatprep.subr.bf16.mxu1 %v2847_v8  ;;  %v2849_v12 = vld [vmem:[%s4106_s5 + $0x10] sm:$0xff]   ;;  %v2850_v13 = vld [vmem:[%s4106_s5 + $0x18] sm:$0xff]   ;;  %s4019_s4 = scalar_lea.vmem [#allocation11], %s2297_s27 }
  0xaa   : > { %s2299_s20 = sshll.u32 %s4218_s15, 3  ;;  %2527 = vmatpush3.bf16.msra.mxu1 %v2847_v8  ;;  %v2846_v14 = vld [vmem:[#allocation2 + $0x38] sm:$0xff]   ;;  %v2851_v15 = vld [vmem:[%s4106_s5 + $0x20] sm:$0xff]   ;;  %v2852_v37 = vld [vmem:[%s4106_s5 + $0x28] sm:$0xff]   ;;  %s2171_s12 = sshll.u32 %s4019_s4, 4  ;;  %s4053_s12 = int_to_ptr.vmem [resolvable:$true] %s2171_s12 }
  0xab   : > { %s3367_s24 = scalar_lea.vmem %s4101_s0, %s2299_s20  ;;  %2528 = vmatprep.subr.bf16.mxu1 %v2848_v9  ;;  %v2853_v38 = vld [vmem:[%s4106_s5 + $0x30] sm:$0xff]   ;;  %v2854_v39 = vld [vmem:[%s4106_s5 + $0x38] sm:$0xff]   ;;  %v915_v40 = vld [vmem:[%s4102_s1] sm:$0xff]  ;;  %s4205_s13 = sld [smem:[#allocation21_spill]] }
  0xac   : > { %2497 = vmatpush3.bf16.msra.mxu0 %v2840_v1  ;;  %v483_v4 = vld [vmem:[%s3367_s24] sm:$0xff]  ;;  %v484_v5 = vld [vmem:[%s3367_s24 + $0x8] sm:$0xff]  ;;  %v485_v16 = vld [vmem:[%s3367_s24 + $0x10] sm:$0xff]  ;;  %968 = vperm.xlu0 %2837, %v915_v40   ;;  %s4206_s26 = sld [smem:[#allocation33_spill]]  ;;  %s4060_s25 = scalar_lea.sflag [#allocation4], %s472_s21 }
  0xad   : > { %2498 = vmatprep.subr.bf16.mxu0 %v2841_v2  ;;  %v499_v6 = vpack.c.bf16 %v484_v5, %v483_v4  ;;  %v486_v17 = vld [vmem:[%s3367_s24 + $0x18] sm:$0xff]  ;;  %v487_v18 = vld [vmem:[%s3367_s24 + $0x20] sm:$0xff]  ;;  %v488_v19 = vld [vmem:[%s3367_s24 + $0x28] sm:$0xff]  ;;  %s3019_s17 = scalar_lea.vmem %s4053_s12, 2048  ;;  %s3103_s19 = smov [#allocation11]  }
  0xae   : > { %2529 = vmatpush3.bf16.msra.mxu1 %v2848_v9  ;;  %v500_v20 = vpack.c.bf16 %v486_v17, %v485_v16  ;;  %v501_v21 = vpack.c.bf16 %v488_v19, %v487_v18  ;;  %v489_v22 = vld [vmem:[%s3367_s24 + $0x30] sm:$0xff]  ;;  %v490_v23 = vld [vmem:[%s3367_s24 + $0x38] sm:$0xff]  ;;  %v491_v24 = vld [vmem:[%s3367_s24 + $0x40] sm:$0xff]  ;;  %p3020_p2 = scmp.ne.s32.totalorder %s4053_s12, %s3019_s17  ;;  %s3023_s16 = sshll.u32 %s3103_s19, 4  ;;  %s3024_s16 = int_to_ptr.vmem [resolvable:$false] %s3023_s16 }
  0xaf   : > { %2510 = vmatprep.mubr.bf16.mxu0 %v499_v6  ;;  %2530 = vmatprep.subr.bf16.mxu1 %v2849_v12  ;;  %v492_v25 = vld [vmem:[%s3367_s24 + $0x48] sm:$0xff]  ;;  %v502_v26 = vpack.c.bf16 %v490_v23, %v489_v22  ;;  %v493_v28 = vld [vmem:[%s3367_s24 + $0x50] sm:$0xff]  ;;  %v494_v29 = vld [vmem:[%s3367_s24 + $0x58] sm:$0xff]  ;;  %s3025_s28 = scalar_lea.vmem %s3024_s16, 4096  ;;  %p3026_p8 = scmp.lt.s32.totalorder %s4053_s12, %s3024_s16 }
  0xb0   : > { %2499 = vmatpush3.bf16.msra.mxu0 %v2841_v2  ;;  %v503_v27 = vpack.c.bf16 %v492_v25, %v491_v24  ;;  %v495_v30 = vld [vmem:[%s3367_s24 + $0x60] sm:$0xff]  ;;  %v496_v31 = vld [vmem:[%s3367_s24 + $0x68] sm:$0xff]  ;;  %v504_v32 = vpack.c.bf16 %v494_v29, %v493_v28  ;;  %v497_v34 = vld [vmem:[%s3367_s24 + $0x70] sm:$0xff]  ;;  %p3027_p11 = scmp.lt.s32.totalorder %s3025_s28, %s3019_s17 }
  0xb1   : > { %2500 = vmatprep.subr.bf16.mxu0 %v2842_v3  ;;  %v505_v33 = vpack.c.bf16 %v496_v31, %v495_v30  ;;  %v498_v35 = vld [vmem:[%s3367_s24 + $0x78] sm:$0xff]  ;;  %v917_v41 = vld [vmem:[%s4102_s1 + $0x10] sm:$0xff]  ;;  %v916_v43 = vld [vmem:[%s4102_s1 + $0x8] sm:$0xff]  ;;  %p4207_p3 = scmp.ne.s32.totalorder %s4205_s13, 0 }
  0xb2   : > { %2531 = vmatpush3.bf16.msra.mxu1 %v2849_v12  ;;  %v506_v36 = vpack.c.bf16 %v498_v35, %v497_v34  ;;  %978 = vperm.xlu1 %2838, %v917_v41   ;;  %v918_v44 = vld [vmem:[%s4102_s1 + $0x18] sm:$0xff]  ;;  %v919_v45 = vld [vmem:[%s4102_s1 + $0x20] sm:$0xff]  ;;  %v920_v46 = vld [vmem:[%s4102_s1 + $0x28] sm:$0xff]  ;;  %s4051_s23 = scalar_lea.hbm %s4206_s26, %s2397_s8  ;;  %p3028_p13 = por %p3027_p11, %p3026_p8 }
  0xb3   : > { %2532 = vmatprep.subr.bf16.mxu1 %v2850_v13  ;;  %973 = vperm.xlu0 %2837, %v916_v43   ;;  %v921_v47 = vld [vmem:[%s4102_s1 + $0x30] sm:$0xff]  ;;  %v922_v48 = vld [vmem:[%s4102_s1 + $0x38] sm:$0xff]  ;;  %v923_v49 = vld [vmem:[%s4102_s1 + $0x40] sm:$0xff]  ;;  %p3021_p4 = pnand %p3020_p2, %p4207_p3 }
  0xb4   : > { %2501 = vmatpush3.bf16.msra.mxu0 %v2842_v3  ;;  %v924_v50 = vld [vmem:[%s4102_s1 + $0x48] sm:$0xff]  ;;  %v925_v51 = vld [vmem:[%s4102_s1 + $0x50] sm:$0xff]  ;;  %v926_v52 = vld [vmem:[%s4102_s1 + $0x58] sm:$0xff] }
  0xb5   : > { %2502 = vmatprep.subr.bf16.mxu0 %v2843_v7  ;;  %v3448_v53 = vld [vmem:[%s4108_s7 + $0x20] sm:$0xff]   ;;  %v928_v55 = vld [vmem:[%s4102_s1 + $0x68] sm:$0xff]  ;;  %v929_v56 = vld [vmem:[%s4102_s1 + $0x70] sm:$0xff]  ;;  %p3022_p7 = pneg %p3021_p4 }
  0xb6   : > { %2533 = vmatpush3.bf16.msra.mxu1 %v2850_v13  ;;  %983 = vperm.xlu1 %2838, %v918_v44   ;;  %v927_v54 = vld [vmem:[%s4102_s1 + $0x60] sm:$0xff]  ;;  %v930_v57 = vld [vmem:[%s4102_s1 + $0x78] sm:$0xff]  ;;  %v1071_v59 = vld [vmem:[%s4103_s2 + $0x8] sm:$0xff] }
  0xb7   : > { %2534 = vmatprep.subr.bf16.mxu1 %v2851_v15  ;;  %988 = vperm.xlu0 %2837, %v919_v45   ;;  %v1070_v58 = vld [vmem:[%s4103_s2] sm:$0xff]  ;;  %v1072_v60 = vld [vmem:[%s4103_s2 + $0x10] sm:$0xff]  ;;  %v1073_v61 = vld [vmem:[%s4103_s2 + $0x18] sm:$0xff]  ;;  %p3029_p0 = pnand %p3028_p13, %p3022_p7 }
  0xb8   : > { %2503 = vmatpush3.bf16.msra.mxu0 %v2843_v7  ;;  %v1074_v62 = vld [vmem:[%s4103_s2 + $0x20] sm:$0xff]  ;;  %v1075_v63 = vld [vmem:[%s4103_s2 + $0x28] sm:$0xff]  ;;  %v1076_v0 = vld [vmem:[%s4103_s2 + $0x30] sm:$0xff] }
  0xb9   : > { %2504 = vmatprep.subr.bf16.mxu0 %v2844_v10  ;;  %v1077_v1 = vld [vmem:[%s4103_s2 + $0x38] sm:$0xff]  ;;  %v1078_v2 = vld [vmem:[%s4103_s2 + $0x40] sm:$0xff]  ;;  %v1079_v3 = vld [vmem:[%s4103_s2 + $0x48] sm:$0xff] }
  0xba   : > { %2535 = vmatpush3.bf16.msra.mxu1 %v2851_v15  ;;  %993 = vperm.xlu1 %2838, %v920_v46   ;;  %v1080_v4 = vld [vmem:[%s4103_s2 + $0x50] sm:$0xff]  ;;  %v1081_v5 = vld [vmem:[%s4103_s2 + $0x58] sm:$0xff]  ;;  %v1082_v6 = vld [vmem:[%s4103_s2 + $0x60] sm:$0xff] }
  0xbb   : > { %2536 = vmatprep.subr.bf16.mxu1 %v2852_v37  ;;  %998 = vperm.xlu0 %2837, %v921_v47   ;;  %v1083_v7 = vld [vmem:[%s4103_s2 + $0x68] sm:$0xff]  ;;  %v1084_v8 = vld [vmem:[%s4103_s2 + $0x70] sm:$0xff]  ;;  %v1085_v9 = vld [vmem:[%s4103_s2 + $0x78] sm:$0xff] }
  0xbc   : > { %2505 = vmatpush3.bf16.msra.mxu0 %v2844_v10  ;;  %v3513_v10 = vld [vmem:[#allocation5] ss:$0 sm:$0xff] }
  0xbd   : > { %2506 = vmatprep.subr.bf16.mxu0 %v2845_v11 }
  0xbe   : > { %2537 = vmatpush3.bf16.msra.mxu1 %v2852_v37  ;;  %1003 = vperm.xlu1 %2838, %v922_v48  }
  0xbf   : > { %2538 = vmatprep.subr.bf16.mxu1 %v2853_v38  ;;  %1008 = vperm.xlu0 %2837, %v923_v49  }
  0xc0   : > { %2507 = vmatpush3.bf16.msra.mxu0 %v2845_v11 }
  0xc1   : > { %2508 = vmatprep.subr.bf16.mxu0 %v2846_v14 }
  0xc2   : > { %2539 = vmatpush3.bf16.msra.mxu1 %v2853_v38  ;;  %1013 = vperm.xlu1 %2838, %v924_v50  }
  0xc3   : > { %2540 = vmatprep.subr.bf16.mxu1 %v2854_v39  ;;  %1018 = vperm.xlu0 %2837, %v925_v51  }
  0xc4   : > { %2509 = vmatpush3.bf16.msra.mxu0 %v2846_v14 }
  0xc5   : > { %2558 = vmatprep.subr.bf16.mxu0 %v3448_v53 }
  0xc6   : > { %2541 = vmatpush3.bf16.msra.mxu1 %v2854_v39  ;;  %1023 = vperm.xlu1 %2838, %v926_v52  }
  0xc7   : > { %2511 = vmatmul.mubr.bf16.vlgmr.msra.gmra.mrb[0].mxu0 %v500_v20  ;;  %2686 = vmatprep.subr.bf16.mxu1 %v3448_v53 }
  0xc8   : > { %2514 = vmatprep.mubr.bf16.mxu0 %v501_v21  ;;  %2559 = vmatpush3.bf16.msra.mxu0 %v3448_v53 }
  0xc9   : > { %1028 = vperm.xlu0 %2837, %v927_v54  }
  0xca   : > { %1033 = vperm.xlu1 %2838, %v928_v55  }
  0xcd   : > { %1038 = vperm.xlu0 %2837, %v929_v56  }
  0xce   : > { %1043 = vperm.xlu1 %2838, %v930_v57  }
  0xcf   : > { %2515 = vmatmul.mubr.bf16.gmra.mrb[4].mxu0 %v502_v26 }
  0xd0   : > { %2518 = vmatprep.mubr.bf16.mxu0 %v503_v27 }
  0xd1   : > { %1121 = vperm.xlu0 %2837, %v1070_v58  }
  0xd2   : > { %1126 = vperm.xlu1 %2838, %v1071_v59  }
  0xd5   : > { %1131 = vperm.xlu0 %2837, %v1072_v60  }
  0xd6   : > { %1136 = vperm.xlu1 %2838, %v1073_v61  }
  0xd7   : > { %2519 = vmatmul.mubr.bf16.gmra.mrb[8].mxu0 %v504_v32 }
  0xd8   : > { %2522 = vmatprep.mubr.bf16.mxu0 %v505_v33 }
  0xd9   : > { %1141 = vperm.xlu0 %2837, %v1074_v62  }
  0xda   : > { %1146 = vperm.xlu1 %2838, %v1075_v63  }
  0xdd   : > { %1151 = vperm.xlu0 %2837, %v1076_v0  }
  0xde   : > { %1156 = vperm.xlu1 %2838, %v1077_v1  }
  0xdf   : > { %2523 = vmatmul.mubr.bf16.gmra.mrb[12].mxu0 %v506_v36 }
  0xe1   : > { %1161 = vperm.xlu0 %2837, %v1078_v2  }
  0xe2   : > { %1166 = vperm.xlu1 %2838, %v1079_v3  }
  0xe5   : > { %1171 = vperm.xlu0 %2837, %v1080_v4  }
  0xe6   : > { %1176 = vperm.xlu1 %2838, %v1081_v5  }
  0xe9   : > { %1181 = vperm.xlu0 %2837, %v1082_v6  }
  0xea   : > { %1186 = vperm.xlu1 %2838, %v1083_v7  }
  0xed   : > { %1191 = vperm.xlu0 %2837, %v1084_v8  }
  0xee   : > { %1196 = vperm.xlu1 %2838, %v1085_v9  }
 0x19a   : > { %v2512_v11 = vpop.f32.mrb[0].mxu0 }
 0x19b   : > { %v621_v12 = vadd.f32 %v2512_v11, %v3513_v10  ;;  %v612_v13 = vpop.f32.mrb[1].mxu0 }
 0x19c   : > { %v613_v14 = vadd.f32 %v3513_v10, %v612_v13  ;;  %v2513_v15 = vpop.f32.mrb[2].mxu0 }
 0x19d   : > { %v677_v16 = vmul.f32 0.1, %v621_v12  ;;  %v624_v17 = vadd.f32 %v2513_v15, %v3513_v10  ;;  %v615_v18 = vpop.f32.mrb[3].mxu0 }
 0x19e   : > { %v675_v19 = vmul.f32 0.1, %v613_v14  ;;  %v616_v20 = vadd.f32 %v3513_v10, %v615_v18 }
 0x19f   : > { %v678_v21 = vmul.f32 0.1, %v624_v17  ;;  %v693_v23 = vmax.f32 %v621_v12, %v677_v16 }
 0x1a0   : > { %v676_v22 = vmul.f32 0.1, %v616_v20  ;;  %v691_v25 = vmax.f32 %v613_v14, %v675_v19 }
 0x1a1   : > { %v694_v24 = vmax.f32 %v624_v17, %v678_v21  ;;  %v2858_v21 = vld [vmem:[%s4108_s7 + $0x38] sm:$0xff]  }
 0x1a2   : > { %v692_v26 = vmax.f32 %v616_v20, %v676_v22  ;;  %v2516_v27 = vpop.f32.mrb[4].mxu0  ;;  %v2857_v20 = vld [vmem:[%s4108_s7 + $0x30] sm:$0xff]   ;;  %v3568_v22 = vld [vmem:[%s4108_s7] sm:$0xff]  }
 0x1a3   : > { %v637_v28 = vadd.f32 %v2516_v27, %v3513_v10  ;;  %v628_v29 = vpop.f32.mrb[5].mxu0  ;;  %v3520_v30 = vpack.c.bf16 %v694_v24, %v693_v23  ;;  %v3571_v23 = vpop.permute.xlu0 %968 }
 0x1a4   : > { %v629_v31 = vadd.f32 %v3513_v10, %v628_v29  ;;  %v2517_v32 = vpop.f32.mrb[6].mxu0  ;;  %v3523_v33 = vpack.c.bf16 %v692_v26, %v691_v25  ;;  %v3573_v24 = vpop.permute.xlu1 %978 }
 0x1a5   : > { %4163 = vst [vmem:[#allocation23_spill] sm:$0xff] %v3520_v30  ;;  %v681_v34 = vmul.f32 0.1, %v637_v28  ;;  %v640_v35 = vadd.f32 %v2517_v32, %v3513_v10  ;;  %v631_v36 = vpop.f32.mrb[7].mxu0 }
 0x1a6   : > { %4164 = vst [vmem:[#allocation24_spill] sm:$0xff] %v3523_v33  ;;  %v679_v37 = vmul.f32 0.1, %v629_v31  ;;  %v632_v38 = vadd.f32 %v3513_v10, %v631_v36  ;;  %2542 = vmatprep.mubr.bf16.mxu1 %v3523_v33 }
 0x1a7   : > { %v682_v39 = vmul.f32 0.1, %v640_v35  ;;  %2543 = vmatmul.mubr.bf16.vlgmr.msra.gmra.mrb[0].mxu1 %v3520_v30  ;;  %v697_v41 = vmax.f32 %v637_v28, %v681_v34  ;;  %v3575_v25 = vpop.permute.xlu0 %973 }
 0x1a8   : > { %v680_v40 = vmul.f32 0.1, %v632_v38  ;;  %2690 = vmatpush3.bf16.msra.mxu1 %v3448_v53  ;;  %v695_v43 = vmax.f32 %v629_v31, %v679_v37  ;;  %v984_v26 = vpop.permute.xlu1 %983 }
 0x1a9   : > { %v698_v42 = vmax.f32 %v640_v35, %v682_v39 }
 0x1aa   : > { %v696_v44 = vmax.f32 %v632_v38, %v680_v40  ;;  %v2520_v45 = vpop.f32.mrb[8].mxu0 }
 0x1ab   : > { %v653_v46 = vadd.f32 %v2520_v45, %v3513_v10  ;;  %v644_v47 = vpop.f32.mrb[9].mxu0  ;;  %v3531_v48 = vpack.c.bf16 %v698_v42, %v697_v41  ;;  %v3577_v27 = vpop.permute.xlu0 %988 }
 0x1ac   : > { %v645_v49 = vadd.f32 %v3513_v10, %v644_v47  ;;  %v2521_v50 = vpop.f32.mrb[10].mxu0  ;;  %v3534_v51 = vpack.c.bf16 %v696_v44, %v695_v43  ;;  %v3579_v28 = vpop.permute.xlu1 %993  ;;  %v3601_v43 = vld [vmem:[#allocation7] ss:$0 sm:$0xff]  ;;  %v947_v44 = vlaneseq }
 0x1ad   : > { %4165 = vst [vmem:[#allocation25_spill] sm:$0xff] %v3531_v48  ;;  %v685_v52 = vmul.f32 0.1, %v653_v46  ;;  %v656_v54 = vadd.f32 %v2521_v50, %v3513_v10  ;;  %v647_v55 = vpop.f32.mrb[11].mxu0 }
 0x1ae   : > { %4166 = vst [vmem:[#allocation26_spill] sm:$0xff] %v3534_v51  ;;  %v683_v53 = vmul.f32 0.1, %v645_v49  ;;  %v648_v56 = vadd.f32 %v3513_v10, %v647_v55  ;;  %2546 = vmatprep.mubr.bf16.mxu1 %v3534_v51 }
 0x1af   : > { %v686_v57 = vmul.f32 0.1, %v656_v54  ;;  %2547 = vmatmul.mubr.bf16.gmra.mrb[4].mxu1 %v3531_v48  ;;  %v701_v59 = vmax.f32 %v653_v46, %v685_v52  ;;  %v3581_v29 = vpop.permute.xlu0 %998 }
 0x1b0   : > { %v684_v58 = vmul.f32 0.1, %v648_v56  ;;  %v699_v61 = vmax.f32 %v645_v49, %v683_v53  ;;  %v3583_v31 = vpop.permute.xlu1 %1003 }
 0x1b1   : > { %v702_v60 = vmax.f32 %v656_v54, %v686_v57 }
 0x1b2   : > { %v700_v62 = vmax.f32 %v648_v56, %v684_v58  ;;  %v2524_v63 = vpop.f32.mrb[12].mxu0  ;;  %v3610_v56 = vshrl.u32 %v947_v44, 7 }
 0x1b3   : > { %v669_v0 = vadd.f32 %v2524_v63, %v3513_v10  ;;  %v660_v1 = vpop.f32.mrb[13].mxu0  ;;  %v3541_v2 = vpack.c.bf16 %v702_v60, %v701_v59  ;;  %v3585_v32 = vpop.permute.xlu0 %1008 }
 0x1b4   : > { %v661_v3 = vadd.f32 %v3513_v10, %v660_v1  ;;  %v2525_v4 = vpop.f32.mrb[14].mxu0  ;;  %v3544_v5 = vpack.c.bf16 %v700_v62, %v699_v61  ;;  %v3587_v34 = vpop.permute.xlu1 %1013  ;;  %vm949_vm0 = vcmp.lt.s32.totalorder %v3610_v56, 1  ;;  %vm1102_vm1 = vcmp.lt.s32.totalorder %v3610_v56, 7  ;;  %v2866_v56 = vld [vmem:[%s4108_s7 + $0x58] sm:$0xff]  }
 0x1b5   : > { %4167 = vst [vmem:[#allocation27_spill] sm:$0xff] %v3541_v2  ;;  %v689_v6 = vmul.f32 0.1, %v669_v0  ;;  %v672_v7 = vadd.f32 %v2525_v4, %v3513_v10  ;;  %v663_v8 = vpop.f32.mrb[15].mxu0 }
 0x1b6   : > { %4168 = vst [vmem:[#allocation28_spill] sm:$0xff] %v3544_v5  ;;  %v687_v9 = vmul.f32 0.1, %v661_v3  ;;  %v664_v11 = vadd.f32 %v3513_v10, %v663_v8  ;;  %2550 = vmatprep.mubr.bf16.mxu1 %v3544_v5  ;;  %v2856_v10 = vld [vmem:[%s4108_s7 + $0x28] sm:$0xff]  }
 0x1b7   : > { %v690_v12 = vmul.f32 0.1, %v672_v7  ;;  %2551 = vmatmul.mubr.bf16.gmra.mrb[8].mxu1 %v3541_v2  ;;  %v705_v14 = vmax.f32 %v669_v0, %v689_v6  ;;  %2560 = vmatprep.subr.bf16.mxu0 %v2856_v10  ;;  %v3589_v35 = vpop.permute.xlu0 %1018 }
 0x1b8   : > { %v688_v13 = vmul.f32 0.1, %v664_v11  ;;  %v703_v16 = vmax.f32 %v661_v3, %v687_v9  ;;  %2687 = vmatprep.subr.bf16.mxu1 %v2856_v10  ;;  %2561 = vmatpush3.bf16.msra.mxu0 %v2856_v10  ;;  %v3591_v36 = vpop.permute.xlu1 %1023 }
 0x1b9   : > { %v706_v15 = vmax.f32 %v672_v7, %v690_v12  ;;  %2691 = vmatpush3.bf16.msra.mxu1 %v2856_v10  ;;  %2562 = vmatprep.subr.bf16.mxu0 %v2857_v20 }
 0x1ba   : > { %v704_v17 = vmax.f32 %v664_v11, %v688_v13  ;;  %2688 = vmatprep.subr.bf16.mxu1 %v2857_v20 }
 0x1bb   : > { %v3550_v18 = vpack.c.bf16 %v706_v15, %v705_v14  ;;  %v3593_v37 = vpop.permute.xlu0 %1028 }
 0x1bc   : > { %v3552_v19 = vpack.c.bf16 %v704_v17, %v703_v16  ;;  %2563 = vmatpush3.bf16.msra.mxu0 %v2857_v20  ;;  %v3595_v38 = vpop.permute.xlu1 %1033 }
 0x1bd   : > { %4169 = vst [vmem:[#allocation29_spill] sm:$0xff] %v3550_v18  ;;  %2692 = vmatpush3.bf16.msra.mxu1 %v2857_v20  ;;  %2564 = vmatprep.subr.bf16.mxu0 %v2858_v21 }
 0x1be   : > { %4170 = vst [vmem:[#allocation30_spill] sm:$0xff] %v3552_v19  ;;  %2554 = vmatprep.mubr.bf16.mxu1 %v3552_v19  ;;  %2689 = vmatprep.subr.bf16.mxu1 %v2858_v21 }
 0x1bf   : > { %2555 = vmatmul.mubr.bf16.gmra.mrb[12].mxu1 %v3550_v18  ;;  %v3597_v39 = vpop.permute.xlu0 %1038 }
 0x1c0   : > { %2565 = vmatpush3.bf16.msra.mxu0 %v2858_v21  ;;  %v3599_v40 = vpop.permute.xlu1 %1043 }
 0x1c1   : > { %2693 = vmatpush3.bf16.msra.mxu1 %v2858_v21  ;;  %2582 = vmatprep.subr.bf16.mxu0 %v3568_v22 }
 0x1c3   : > { %v1122_v41 = vpop.permute.xlu0 %1121 }
 0x1c4   : > { %v1127_v42 = vpop.permute.xlu1 %1126 }
 0x1c7   : > { %v3604_v49 = vpop.permute.xlu0 %1131 }
 0x1c8   : > { %v3607_v54 = vpop.permute.xlu1 %1136 }
 0x1cb   : > { %v3619_v1 = vpop.permute.xlu0 %1141 }
 0x1cc   : > { %v3622_v9 = vpop.permute.xlu1 %1146 }
 0x27a   : > { %v2544_v45 = vpop.f32.mrb[0].mxu1 }
 0x27b   : > { %v829_v46 = vadd.f32 %v2544_v45, %v3601_v43  ;;  %v820_v47 = vpop.f32.mrb[1].mxu1 }
 0x27c   : > { %v821_v50 = vadd.f32 %v3601_v43, %v820_v47  ;;  %v2545_v52 = vpop.f32.mrb[2].mxu1 }
 0x27d   : > { %v885_v55 = vmul.f32 0.1, %v829_v46  ;;  %v832_v53 = vadd.f32 %v2545_v52, %v3601_v43  ;;  %v823_v57 = vpop.f32.mrb[3].mxu1  ;;  %v2860_v52 = vld [vmem:[%s4108_s7 + $0x8] sm:$0xff]  }
 0x27e   : > { %v883_v58 = vmul.f32 0.1, %v821_v50  ;;  %v824_v59 = vadd.f32 %v3601_v43, %v823_v57 }
 0x27f   : > { %v901_v60 = vmax.f32 %v829_v46, %v885_v55  ;;  %v886_v61 = vmul.f32 0.1, %v832_v53 }
 0x280   : > { %v3613_v62 = vmax.f32 %v821_v50, %v883_v58  ;;  %v884_v63 = vmul.f32 0.1, %v824_v59 }
 0x281   : > { %v3615_v0 = vmax.f32 %v832_v53, %v886_v61  ;;  %v933_v3 = vrot.slane %v901_v60, 7  ;;  %v1088_v7 = vrot.slane %v901_v60, 1 }
 0x282   : > { %v4126_v4 = vrot.slane %v3613_v62, 1  ;;  %v900_v6 = vmax.f32 %v824_v59, %v884_v63  ;;  %v2548_v8 = vpop.f32.mrb[4].mxu1  ;;  %v4127_v59 = vrot.slane %v3613_v62, 7  ;;  %v1152_v63 = vpop.permute.xlu0 %1151 }
 0x283   : > { %v934_v11 = vrot.slane %v3615_v0, 7  ;;  %v1232_v12 = vpack.c.bf16 %v3615_v0, %v901_v60  ;;  %v1089_v13 = vrot.slane %v3615_v0, 1  ;;  %v845_v14 = vadd.f32 %v2548_v8, %v3601_v43  ;;  %v836_v15 = vpop.f32.mrb[5].mxu1 }
 0x284   : > { %v932_v16 = vrot.slane %v900_v6, 7  ;;  %v1231_v17 = vpack.c.bf16 %v900_v6, %v3613_v62  ;;  %v1087_v10 = vrot.slane %v900_v6, 1  ;;  %v837_v20 = vadd.f32 %v3601_v43, %v836_v15  ;;  %v2549_v21 = vpop.f32.mrb[6].mxu1  ;;  %v3663_v15 = vpop.permute.xlu1 %1156 }
 0x285   : > { %v962_v44 = vsel %vm949_vm0, %v933_v3, %v934_v11  ;;  %v1115_v45 = vsel %vm1102_vm1, %v1088_v7, %v1089_v13  ;;  %v889_v46 = vmul.f32 0.1, %v845_v14  ;;  %v848_v47 = vadd.f32 %v2549_v21, %v3601_v43  ;;  %v839_v50 = vpop.f32.mrb[7].mxu1 }
 0x286   : > { %v3640_v55 = vmul.f32 %v984_v26, %v962_v44  ;;  %v963_v53 = vsel %vm949_vm0, %v932_v16, %v933_v3  ;;  %v1116_v57 = vsel %vm1102_vm1, %v1087_v10, %v1088_v7  ;;  %v1117_v58 = vsel %vm1102_vm1, %v4126_v4, %v1087_v10  ;;  %2566 = vmatprep.mubr.msk.bf16.mxu0 %vm1272_vm2, %v1231_v17 }
 0x287   : > { %v3653_v60 = vmul.f32 %v3573_v24, %v963_v53  ;;  %v3655_v26 = vmul.f32 %v1122_v41, %v1117_v58  ;;  %v3657_v61 = vmul.f32 %v1127_v42, %v1116_v57  ;;  %2567 = vmatmul.mubr.msk.bf16.vlgmr.msra.gmra.mrb[16].mxu0 %vm1272_vm2, %v1232_v12  ;;  %v3660_v3 = vmax.f32 %v845_v14, %v889_v46  ;;  %v2861_v42 = vld [vmem:[%s4108_s7 + $0x10] sm:$0xff]  }
 0x288   : > { %v887_v6 = vmul.f32 0.1, %v837_v20  ;;  %v890_v7 = vmul.f32 0.1, %v848_v47  ;;  %v840_v8 = vadd.f32 %v3601_v43, %v839_v50  ;;  %2583 = vmatpush3.bf16.msra.mxu0 %v3568_v22  ;;  %v964_v12 = vsel %vm949_vm0, %v4127_v59, %v932_v16 }
 0x289   : > { %2584 = vmatprep.subr.bf16.mxu0 %v2860_v52  ;;  %v3682_v21 = vmul.f32 %v3604_v49, %v1115_v45  ;;  %v1092_v46 = vrot.slane %v3660_v3, 1  ;;  %v3692_v58 = vmul.f32 %v3575_v25, %v964_v12  ;;  %v1167_v25 = vpop.permute.xlu1 %1166 }
 0x28a   : > { %v3677_v14 = vmax.f32 %v837_v20, %v887_v6  ;;  %v3679_v17 = vmax.f32 %v848_v47, %v890_v7  ;;  %v888_v22 = vmul.f32 0.1, %v840_v8  ;;  %v2552_v10 = vpop.f32.mrb[8].mxu1 }
 0x28b   : > { %v861_v50 = vadd.f32 %v2552_v10, %v3601_v43  ;;  %v852_v53 = vpop.f32.mrb[9].mxu1  ;;  %v3698_v10 = vpop.permute.xlu0 %1161 }
 0x28c   : > { %v4129_v57 = vrot.slane %v3677_v14, 7  ;;  %v1090_v16 = vrot.slane %v3677_v14, 1  ;;  %v1234_v20 = vpack.c.bf16 %v3679_v17, %v3660_v3  ;;  %v2553_v47 = vpop.f32.mrb[10].mxu1  ;;  %2585 = vmatpush3.bf16.msra.mxu0 %v2860_v52  ;;  %v3694_v49 = vmax.f32 %v840_v8, %v888_v22  ;;  %v2862_v8 = vld [vmem:[%s4108_s7 + $0x18] sm:$0xff]  }
 0x28d   : > { %v4128_v45 = vrot.slane %v3679_v17, 1  ;;  %v893_v6 = vmul.f32 0.1, %v861_v50  ;;  %v853_v7 = vadd.f32 %v3601_v43, %v852_v53  ;;  %v855_v41 = vpop.f32.mrb[11].mxu1  ;;  %2586 = vmatprep.subr.bf16.mxu0 %v2861_v42  ;;  %v864_v52 = vadd.f32 %v2553_v47, %v3601_v43 }
 0x28e   : > { %v1114_v24 = vsel %vm1102_vm1, %v1089_v13, %v1090_v16  ;;  %v3713_v12 = vsel %vm949_vm0, %v934_v11, %v4129_v57  ;;  %v1233_v13 = vpack.c.bf16 %v3694_v49, %v3677_v14  ;;  %v1091_v53 = vrot.slane %v3694_v49, 1 }
 0x28f   : > { %v3716_v22 = vmul.f32 %v3607_v54, %v1114_v24  ;;  %v856_v47 = vadd.f32 %v3601_v43, %v855_v41  ;;  %v1111_v59 = vsel %vm1102_vm1, %v1092_v46, %v4128_v45  ;;  %v3726_v0 = vmax.f32 %v861_v50, %v893_v6  ;;  %v3740_v50 = vld [vmem:[%s4108_s7 + $0x40] sm:$0xff]  }
 0x290   : > { %v891_v44 = vmul.f32 0.1, %v853_v7  ;;  %v894_v11 = vmul.f32 0.1, %v864_v52  ;;  %2587 = vmatpush3.bf16.msra.mxu0 %v2861_v42  ;;  %v1112_v24 = vsel %vm1102_vm1, %v1091_v53, %v1092_v46  ;;  %v1113_v4 = vsel %vm1102_vm1, %v1090_v16, %v1091_v53  ;;  %2570 = vmatprep.mubr.msk.bf16.mxu0 %vm1272_vm2, %v1233_v13  ;;  %v3755_v53 = vpop.permute.xlu0 %1171 }
 0x291   : > { %v3734_v41 = vmul.f32 %v1152_v63, %v1111_v59  ;;  %v3744_v6 = vmul.f32 %v3619_v1, %v1113_v4  ;;  %v3747_v54 = vmul.f32 %v3622_v9, %v1112_v24  ;;  %2571 = vmatmul.mubr.msk.bf16.gmra.mrb[20].mxu0 %vm1272_vm2, %v1234_v20  ;;  %2588 = vmatprep.subr.bf16.mxu0 %v2862_v8  ;;  %v892_v13 = vmul.f32 0.1, %v856_v47  ;;  %v3762_v20 = vpop.permute.xlu1 %1176 }
 0x292   : > { %v3749_v46 = vmax.f32 %v853_v7, %v891_v44  ;;  %v2556_v59 = vpop.f32.mrb[12].mxu1  ;;  %v3753_v16 = vmax.f32 %v864_v52, %v894_v11  ;;  %v1096_v44 = vrot.slane %v3726_v0, 1 }
 0x293   : > { %v877_v45 = vadd.f32 %v2556_v59, %v3601_v43  ;;  %v868_v1 = vpop.f32.mrb[13].mxu1  ;;  %v3768_v59 = vmax.f32 %v856_v47, %v892_v13 }
 0x294   : > { %v869_v7 = vadd.f32 %v3601_v43, %v868_v1  ;;  %v2557_v24 = vpop.f32.mrb[14].mxu1  ;;  %2589 = vmatpush3.bf16.msra.mxu0 %v2862_v8  ;;  %v1236_v11 = vpack.c.bf16 %v3753_v16, %v3726_v0  ;;  %v4134_v63 = vrot.slane %v3753_v16, 1  ;;  %v4171_v8 = vrot.slane %v3749_v46, 1 }
 0x295   : > { %v871_v4 = vpop.f32.mrb[15].mxu1  ;;  %2606 = vmatprep.subr.bf16.mxu0 %v3740_v50  ;;  %v897_v9 = vmul.f32 0.1, %v877_v45  ;;  %v880_v42 = vadd.f32 %v2557_v24, %v3601_v43  ;;  %v1235_v52 = vpack.c.bf16 %v3768_v59, %v3749_v46  ;;  %v1095_v18 = vrot.slane %v3768_v59, 1 }
 0x296   : > { %v895_v57 = vmul.f32 0.1, %v869_v7  ;;  %v872_v1 = vadd.f32 %v3601_v43, %v871_v4  ;;  %v3782_v47 = vsel %vm1102_vm1, %v1096_v44, %v4134_v63  ;;  %v940_v13 = vrot.slane %v3768_v59, 7 }
 0x297   : > { %v3785_v19 = vmax.f32 %v877_v45, %v897_v9  ;;  %v898_v43 = vmul.f32 0.1, %v880_v42  ;;  %v1108_v4 = vsel %vm1102_vm1, %v1095_v18, %v1096_v44  ;;  %v1109_v2 = vsel %vm1102_vm1, %v4171_v8, %v1095_v18  ;;  %2574 = vmatprep.mubr.msk.bf16.mxu1 %vm1272_vm2, %v1235_v52  ;;  %v1182_v18 = vpop.permute.xlu0 %1181  ;;  %v1187_v8 = vpop.permute.xlu1 %1186 }
 0x298   : > { %v3787_v24 = vmax.f32 %v869_v7, %v895_v57  ;;  %v896_v5 = vmul.f32 0.1, %v872_v1  ;;  %v4172_v63 = vrot.slane %v3694_v49, 7  ;;  %v4173_v59 = vrot.slane %v3677_v14, 7  ;;  %2575 = vmatmul.mubr.msk.bf16.vlgmr.msra.gmra.mrb[16].mxu1 %vm1272_vm2, %v1236_v11 }
 0x299   : > { %v3803_v45 = vmul.f32 %v3698_v10, %v1109_v2  ;;  %v3805_v9 = vmul.f32 %v1167_v25, %v1108_v4  ;;  %v945_v44 = vrot.slane %v3785_v19, 7  ;;  %v914_v48 = vmax.f32 %v880_v42, %v898_v43 }
 0x29a   : > { %v960_v57 = vsel %vm949_vm0, %v4173_v59, %v4172_v63  ;;  %v943_v7 = vrot.slane %v3787_v24, 7  ;;  %v912_v14 = vmax.f32 %v872_v1, %v896_v5  ;;  %v1100_v51 = vrot.slane %v3785_v19, 1 }
 0x29b   : > { %v1050_v10 = vmul.f32 %v3577_v27, %v3713_v12  ;;  %v1051_v25 = vmul.f32 %v3579_v28, %v960_v57  ;;  %v4174_v63 = vrot.slane %v3679_v17, 7  ;;  %v4175_v4 = vrot.slane %v3660_v3, 7 }
 0x29c   : > { %v946_v59 = vrot.slane %v914_v48, 7  ;;  %v1238_v5 = vpack.c.bf16 %v914_v48, %v3785_v19  ;;  %v944_v42 = vrot.slane %v912_v14, 7  ;;  %v1237_v1 = vpack.c.bf16 %v912_v14, %v3787_v24 }
 0x29d   : > { %v958_v11 = vsel %vm949_vm0, %v4175_v4, %v4174_v63  ;;  %v1099_v43 = vrot.slane %v912_v14, 1  ;;  %v1101_v2 = vrot.slane %v914_v48, 1  ;;  %v1064_v52 = vpack.c.bf16 %v1051_v25, %v1050_v10 }
 0x29e   : > { %v4176_v27 = vmov %v4175_v4  ;;  %v4177_v28 = vrot.slane %v3694_v49, 7  ;;  %2578 = vmatprep.mubr.msk.bf16.mxu1 %vm1272_vm2, %v1237_v1  ;;  %v4178_v57 = vrot.slane %v3613_v62, 7  ;;  %v1053_v14 = vmul.f32 %v3583_v31, %v958_v11  ;;  %v1192_v4 = vpop.permute.xlu0 %1191 }
 0x29f   : > { %v4179_v48 = vrot.slane %v3749_v46, 7  ;;  %v1104_v49 = vsel %vm1102_vm1, %v1099_v43, %v1100_v51  ;;  %v4180_v10 = vrot.slane %v3787_v24, 1  ;;  %v1103_v1 = vsel %vm1102_vm1, %v1100_v51, %v1101_v2 }
 0x2a0   : > { %v959_v12 = vsel %vm949_vm0, %v4177_v28, %v4176_v27  ;;  %v965_v19 = vsel %vm949_vm0, %v946_v59, %v4178_v57  ;;  %v4181_v31 = vrot.slane %v3613_v62, 1  ;;  %v1212_v28 = vmul.f32 %v1187_v8, %v1104_v49  ;;  %2579 = vmatmul.mubr.msk.bf16.gmra.mrb[20].mxu1 %vm1272_vm2, %v1238_v5 }
 0x2a1   : > { %v1052_v63 = vmul.f32 %v3581_v29, %v959_v12  ;;  %v956_v3 = vsel %vm949_vm0, %v4179_v48, %v940_v13  ;;  %v1105_v25 = vsel %vm1102_vm1, %v4180_v10, %v1099_v43  ;;  %v1197_v29 = vpop.permute.xlu1 %1196  ;;  %v1213_v12 = vmul.f32 %v1192_v4, %v1103_v1 }
 0x2a2   : > { %v1118_v11 = vsel %vm1102_vm1, %v1101_v2, %v4181_v31  ;;  %v1211_v27 = vmul.f32 %v1182_v18, %v1105_v25  ;;  %v1046_v48 = vmul.f32 %v3571_v23, %v965_v19  ;;  %v4182_v43 = vrot.slane %v3749_v46, 7 }
 0x2a3   : > { %v1214_v57 = vmul.f32 %v1197_v29, %v1118_v11  ;;  %v1065_v30 = vpack.c.bf16 %v1053_v14, %v1052_v63  ;;  %v4183_v10 = vrot.slane %v3679_v17, 7  ;;  %v1055_v62 = vmul.f32 %v3587_v34, %v956_v3 }
 0x2a4   : > { %v1221_v33 = vpack.c.bf16 %v1212_v28, %v1211_v27  ;;  %v4184_v8 = vrot.slane %v3753_v16, 7  ;;  %v4185_v5 = vrot.slane %v3726_v0, 7  ;;  %v1062_v19 = vpack.c.bf16 %v3692_v58, %v1046_v48  ;;  %v3969_v27 = vld [vmem:[#allocation8] ss:$0 sm:$0xff] }
 0x2a5   : > { %v957_v51 = vsel %vm949_vm0, %v4183_v10, %v4182_v43  ;;  %v1222_v2 = vpack.c.bf16 %v1214_v57, %v1213_v12  ;;  %v952_v3 = vsel %vm949_vm0, %v943_v7, %v944_v42  ;;  %v951_v1 = vsel %vm949_vm0, %v944_v42, %v945_v44 }
 0x2a6   : > { %v1054_v18 = vmul.f32 %v3585_v32, %v957_v51  ;;  %v954_v23 = vsel %vm949_vm0, %v4185_v5, %v4184_v8  ;;  %v4186_v63 = vmov %v4185_v5  ;;  %v2864_v32 = vld [vmem:[%s4108_s7 + $0x48] sm:$0xff]   ;;  %v4187_v4 = vmov %v4184_v8  ;;  %2590 = vmatprep.mubr.msk.bf16.mxu0 %vm1272_vm2, %v1062_v19 }
 0x2a7   : > { %v955_v14 = vsel %vm949_vm0, %v940_v13, %v4186_v63  ;;  %v1057_v34 = vmul.f32 %v3591_v36, %v954_v23  ;;  %v953_v58 = vsel %vm949_vm0, %v4187_v4, %v943_v7  ;;  %v1059_v0 = vmul.f32 %v3595_v38, %v952_v3 }
 0x2a8   : > { %v1066_v49 = vpack.c.bf16 %v1055_v62, %v1054_v18  ;;  %v1056_v25 = vmul.f32 %v3589_v35, %v955_v14  ;;  %v1058_v36 = vmul.f32 %v3593_v37, %v953_v58  ;;  %v950_v13 = vsel %vm949_vm0, %v945_v44, %v946_v59 }
 0x2a9   : > { %v4188_v29 = vrot.slane %v3749_v46, 1  ;;  %v4189_v35 = vrot.slane %v3679_v17, 1  ;;  %v4190_v38 = vpack.c.bf16 %v3640_v55, %v3653_v60  ;;  %v1060_v37 = vmul.f32 %v3597_v39, %v951_v1  ;;  %v2865_v39 = vld [vmem:[%s4108_s7 + $0x50] sm:$0xff]  }
 0x2aa   : > { %v1067_v7 = vpack.c.bf16 %v1057_v34, %v1056_v25  ;;  %v1061_v59 = vmul.f32 %v3599_v40, %v950_v13  ;;  %v1068_v17 = vpack.c.bf16 %v1059_v0, %v1058_v36  ;;  %v4191_v46 = vrot.slane %v3787_v24, 1  ;;  %v2872_v1 = vld [vmem:[#allocation10 + $0x8] sm:$0xff]  }
 0x2ab   : > { %v1110_v31 = vsel %vm1102_vm1, %v4189_v35, %v4188_v29  ;;  %2591 = vmatmul.mubr.msk.bf16.vlgmr.msra.gmra.mrb[16].mxu0 %vm1272_vm2, %v4190_v38  ;;  %v4192_v44 = vrot.slane %v3753_v16, 1  ;;  %v1209_v60 = vmul.f32 %v3755_v53, %v3782_v47  ;;  %v4194_v16 = vpack.c.bf16 %v3716_v22, %v3682_v21  ;;  %v2869_v21 = vld [vmem:[%s4111_s10 + $0x10] sm:$0xff]   ;;  %v2871_v22 = vld [vmem:[#allocation10] sm:$0xff]  }
 0x2ac   : > { %v1206_v11 = vmul.f32 %v3663_v15, %v1110_v31  ;;  %2607 = vmatpush3.bf16.msra.mxu0 %v3740_v50  ;;  %2594 = vmatprep.mubr.msk.bf16.mxu0 %vm1272_vm2, %v1064_v52  ;;  %v1069_v40 = vpack.c.bf16 %v1061_v59, %v1060_v37  ;;  %v4196_v53 = vpack.c.bf16 %v3805_v9, %v3803_v45  ;;  %v2873_v59 = vld [vmem:[#allocation10 + $0x10] sm:$0xff]  }
 0x2ad   : > { %v1106_v55 = vsel %vm1102_vm1, %v4192_v44, %v4191_v46  ;;  %2608 = vmatprep.subr.bf16.mxu0 %v2864_v32 }
 0x2ae   : > { %v1218_v15 = vpack.c.bf16 %v1206_v11, %v3734_v41  ;;  %v1210_v50 = vmul.f32 %v3762_v20, %v1106_v55  ;;  %v4193_v41 = vpack.c.bf16 %v3657_v61, %v3655_v26  ;;  %v2867_v26 = vld [vmem:[%s4111_s10] sm:$0xff]   ;;  %v2868_v61 = vld [vmem:[%s4111_s10 + $0x8] sm:$0xff]  }
 0x2af   : > { %2630 = vmatprep.subr.bf16.mxu1 %v2867_v26 }
 0x2b0   : > { %v1220_v52 = vpack.c.bf16 %v1210_v50, %v1209_v60  ;;  %2609 = vmatpush3.bf16.msra.mxu0 %v2864_v32  ;;  %2631 = vmatpush3.bf16.msra.mxu1 %v2867_v26 }
 0x2b1   : > { %2610 = vmatprep.subr.bf16.mxu0 %v2865_v39  ;;  %2632 = vmatprep.subr.bf16.mxu1 %v2868_v61 }
 0x2b3   : > { %2595 = vmatmul.mubr.msk.bf16.gmra.mrb[20].mxu0 %vm1272_vm2, %v1065_v30  ;;  %v4195_v30 = vpack.c.bf16 %v3747_v54, %v3744_v6 }
 0x2b4   : > { %2598 = vmatprep.mubr.msk.bf16.mxu0 %vm1272_vm2, %v1066_v49  ;;  %2611 = vmatpush3.bf16.msra.mxu0 %v2865_v39 }
 0x2b5   : > { %2612 = vmatprep.subr.bf16.mxu0 %v2866_v56  ;;  %2633 = vmatpush3.bf16.msra.mxu1 %v2868_v61 }
 0x2b6   : > { %2634 = vmatprep.subr.bf16.mxu1 %v2869_v21 }
 0x2b8   : > { %2613 = vmatpush3.bf16.msra.mxu0 %v2866_v56 }
 0x2b9   : > { %2635 = vmatpush3.bf16.msra.mxu1 %v2869_v21 }
 0x2bb   : > { %2599 = vmatmul.mubr.msk.bf16.gmra.mrb[24].mxu0 %vm1272_vm2, %v1067_v7 }
 0x2bc   : > { %2602 = vmatprep.mubr.msk.bf16.mxu0 %vm1272_vm2, %v1068_v17 }
 0x2c3   : > { %2603 = vmatmul.mubr.msk.bf16.gmra.mrb[28].mxu0 %vm1272_vm2, %v1069_v40 }
 0x2c4   : > { %2614 = vmatprep.mubr.msk.bf16.mxu0 %vm1272_vm2, %v4193_v41  ;;  %v2874_v41 = vld [vmem:[#allocation10 + $0x18] sm:$0xff]  }
 0x2cb   : > { %2615 = vmatmul.mubr.msk.bf16.vlgmr.msra.gmra.mrb[16].mxu0 %vm1272_vm2, %v4194_v16 }
 0x2cc   : > { %2618 = vmatprep.mubr.msk.bf16.mxu0 %vm1272_vm2, %v4195_v30 }
 0x2d3   : > { %2619 = vmatmul.mubr.msk.bf16.gmra.mrb[20].mxu0 %vm1272_vm2, %v1218_v15 }
 0x2d4   : > { %2622 = vmatprep.mubr.msk.bf16.mxu0 %vm1272_vm2, %v4196_v53 }
 0x2db   : > { %2623 = vmatmul.mubr.msk.bf16.gmra.mrb[24].mxu0 %vm1272_vm2, %v1220_v52 }
 0x2dc   : > { %2626 = vmatprep.mubr.msk.bf16.mxu0 %vm1272_vm2, %v1221_v33  ;;  %v2870_v33 = vld [vmem:[%s4111_s10 + $0x18] sm:$0xff]  }
 0x2dd   : > { %2636 = vmatprep.subr.bf16.mxu1 %v2870_v33 }
 0x2de   : > { %2637 = vmatpush3.bf16.msra.mxu1 %v2870_v33 }
 0x2df   : > { %2654 = vmatprep.subr.bf16.mxu1 %v2871_v22 }
 0x2e3   : > { %2627 = vmatmul.mubr.msk.bf16.gmra.mrb[28].mxu0 %vm1272_vm2, %v1222_v2 }
 0x36b   : > { %v2576_v54 = vpop.f32.mrb[16].mxu1 }
 0x36c   : > { %v1363_v6 = vpop.f32.mrb[17].mxu1 }
 0x36d   : > { %v2577_v20 = vpop.f32.mrb[18].mxu1 }
 0x36e   : > { %v1366_v47 = vpop.f32.mrb[19].mxu1 }
 0x373   : > { %v3961_v24 = vpop.f32.mrb[20].mxu1 }
 0x374   : > { %v3963_v45 = vpop.f32.mrb[21].mxu1 }
 0x375   : > { %v3965_v9 = vpop.f32.mrb[22].mxu1 }
 0x376   : > { %v3967_v42 = vpop.f32.mrb[23].mxu1 }
 0x39e   : > { %v2616_v28 = vpop.f32.mrb[16].mxu0 }
 0x39f   : > { %v1718_v12 = vadd.f32 %v2616_v28, %v3969_v27  ;;  %v1630_v57 = vpop.f32.mrb[17].mxu0 }
 0x3a0   : > { %v1716_v48 = vadd.f32 %v3969_v27, %v1630_v57  ;;  %v2617_v43 = vpop.f32.mrb[18].mxu0 }
 0x3a1   : > { %v1734_v10 = vmul.f32 0.1, %v1718_v12  ;;  %v1719_v51 = vadd.f32 %v2617_v43, %v3969_v27  ;;  %v1633_v62 = vpop.f32.mrb[19].mxu0 }
 0x3a2   : > { %v1732_v2 = vmul.f32 0.1, %v1716_v48  ;;  %v1717_v18 = vadd.f32 %v3969_v27, %v1633_v62 }
 0x3a3   : > { %v1735_v8 = vmul.f32 0.1, %v1719_v51  ;;  %v1750_v23 = vmax.f32 %v1718_v12, %v1734_v10 }
 0x3a4   : > { %v1733_v5 = vmul.f32 0.1, %v1717_v18  ;;  %v1748_v63 = vmax.f32 %v1716_v48, %v1732_v2 }
 0x3a5   : > { %v1751_v19 = vmax.f32 %v1719_v51, %v1735_v8  ;;  %v2876_v8 = vld [vmem:[#allocation10 + $0x28] sm:$0xff]  }
 0x3a6   : > { %v1749_v14 = vmax.f32 %v1717_v18, %v1733_v5  ;;  %v2620_v34 = vpop.f32.mrb[20].mxu0 }
 0x3a7   : > { %v1765_v3 = vpack.c.bf16 %v1751_v19, %v1750_v23  ;;  %v1722_v32 = vadd.f32 %v2620_v34, %v3969_v27  ;;  %v1646_v49 = vpop.f32.mrb[21].mxu0 }
 0x3a8   : > { %v1764_v25 = vpack.c.bf16 %v1749_v14, %v1748_v63  ;;  %v1720_v4 = vadd.f32 %v3969_v27, %v1646_v49  ;;  %v2621_v58 = vpop.f32.mrb[22].mxu0 }
 0x3a9   : > { %v1738_v0 = vmul.f32 0.1, %v1722_v32  ;;  %v1723_v36 = vadd.f32 %v2621_v58, %v3969_v27  ;;  %v1649_v13 = vpop.f32.mrb[23].mxu0  ;;  %v2878_v58 = vld [vmem:[#allocation10 + $0x38] sm:$0xff]  }
 0x3aa   : > { %v1736_v29 = vmul.f32 0.1, %v1720_v4  ;;  %v1721_v35 = vadd.f32 %v3969_v27, %v1649_v13  ;;  %2638 = vmatprep.mubr.msk.bf16.mxu1 %vm1272_vm2, %v1764_v25  ;;  %v4199_v13 = vld [vmem:[#allocation26_spill] sm:$0xff] }
 0x3ab   : > { %v1739_v31 = vmul.f32 0.1, %v1723_v36  ;;  %2639 = vmatmul.mubr.msk.bf16.vlgmr.msra.gmra.mrb[24].mxu1 %vm1272_vm2, %v1765_v3  ;;  %v1754_v7 = vmax.f32 %v1722_v32, %v1738_v0 }
 0x3ac   : > { %v1737_v38 = vmul.f32 0.1, %v1721_v35  ;;  %2655 = vmatpush3.bf16.msra.mxu1 %v2871_v22  ;;  %v1752_v11 = vmax.f32 %v1720_v4, %v1736_v29  ;;  %v2875_v22 = vld [vmem:[#allocation10 + $0x20] sm:$0xff]   ;;  %v4201_v29 = vld [vmem:[#allocation28_spill] sm:$0xff] }
 0x3ad   : > { %v1755_v37 = vmax.f32 %v1723_v36, %v1739_v31  ;;  %2656 = vmatprep.subr.bf16.mxu1 %v2872_v1  ;;  %v4198_v36 = vld [vmem:[#allocation23_spill] sm:$0xff]  ;;  %v4203_v31 = vld [vmem:[#allocation30_spill] sm:$0xff] }
 0x3ae   : > { %v1753_v17 = vmax.f32 %v1721_v35, %v1737_v38  ;;  %v2624_v46 = vpop.f32.mrb[24].mxu0  ;;  %v4202_v35 = vld [vmem:[#allocation27_spill] sm:$0xff]  ;;  %v4204_v38 = vld [vmem:[#allocation29_spill] sm:$0xff] }
 0x3af   : > { %v1767_v44 = vpack.c.bf16 %v1755_v37, %v1754_v7  ;;  %v2694_v55 = vadd.f32 %v2624_v46, %v2576_v54  ;;  %v1662_v60 = vpop.f32.mrb[25].mxu0  ;;  %v4011_v7 = vld [vmem:[%s4112_s11] ss:$0 sm:$0xff] }
 0x3b0   : > { %v1766_v39 = vpack.c.bf16 %v1753_v17, %v1752_v11  ;;  %v2695_v40 = vadd.f32 %v1662_v60, %v1363_v6  ;;  %v2625_v15 = vpop.f32.mrb[26].mxu0  ;;  %2657 = vmatpush3.bf16.msra.mxu1 %v2872_v1  ;;  %v4200_v1 = vld [vmem:[#allocation25_spill] sm:$0xff] }
 0x3b1   : > { %v1726_v50 = vadd.f32 %v2694_v55, %v3969_v27  ;;  %v2696_v52 = vadd.f32 %v2625_v15, %v2577_v20  ;;  %v1665_v56 = vpop.f32.mrb[27].mxu0  ;;  %2658 = vmatprep.subr.bf16.mxu1 %v2873_v59 }
 0x3b2   : > { %v1724_v16 = vadd.f32 %v2695_v40, %v3969_v27  ;;  %v2697_v30 = vadd.f32 %v1665_v56, %v1366_v47  ;;  %2642 = vmatprep.mubr.msk.bf16.mxu1 %vm1272_vm2, %v1766_v39 }
 0x3b3   : > { %v1742_v53 = vmul.f32 0.1, %v1726_v50  ;;  %v1727_v26 = vadd.f32 %v2696_v52, %v3969_v27  ;;  %2643 = vmatmul.mubr.msk.bf16.gmra.mrb[28].mxu1 %vm1272_vm2, %v1767_v44 }
 0x3b4   : > { %v1740_v61 = vmul.f32 0.1, %v1724_v16  ;;  %v1725_v21 = vadd.f32 %v2697_v30, %v3969_v27  ;;  %2659 = vmatpush3.bf16.msra.mxu1 %v2873_v59 }
 0x3b5   : > { %v1743_v33 = vmul.f32 0.1, %v1727_v26  ;;  %2660 = vmatprep.subr.bf16.mxu1 %v2874_v41  ;;  %v1758_v20 = vmax.f32 %v1726_v50, %v1742_v53 }
 0x3b6   : > { %v1741_v54 = vmul.f32 0.1, %v1725_v21  ;;  %v2628_v6 = vpop.f32.mrb[28].mxu0  ;;  %v1756_v57 = vmax.f32 %v1724_v16, %v1740_v61 }
 0x3b7   : > { %v1759_v28 = vmax.f32 %v1727_v26, %v1743_v33  ;;  %v2698_v47 = vadd.f32 %v2628_v6, %v3961_v24  ;;  %v1678_v12 = vpop.f32.mrb[29].mxu0 }
 0x3b8   : > { %v1757_v48 = vmax.f32 %v1725_v21, %v1741_v54  ;;  %v2699_v43 = vadd.f32 %v1678_v12, %v3963_v45  ;;  %v2629_v10 = vpop.f32.mrb[30].mxu0  ;;  %2661 = vmatpush3.bf16.msra.mxu1 %v2874_v41 }
 0x3b9   : > { %v1769_v51 = vpack.c.bf16 %v1759_v28, %v1758_v20  ;;  %v1730_v62 = vadd.f32 %v2698_v47, %v3969_v27  ;;  %v2700_v2 = vadd.f32 %v2629_v10, %v3965_v9  ;;  %v1681_v18 = vpop.f32.mrb[31].mxu0  ;;  %2662 = vmatprep.subr.bf16.mxu1 %v2875_v22  ;;  %v2877_v9 = vld [vmem:[#allocation10 + $0x30] sm:$0xff]  }
 0x3ba   : > { %v1768_v5 = vpack.c.bf16 %v1757_v48, %v1756_v57  ;;  %v1728_v23 = vadd.f32 %v2699_v43, %v3969_v27  ;;  %v2701_v24 = vadd.f32 %v1681_v18, %v3967_v42 }
 0x3bb   : > { %v1746_v19 = vmul.f32 0.1, %v1730_v62  ;;  %v1731_v63 = vadd.f32 %v2700_v2, %v3969_v27 }
 0x3bc   : > { %v1744_v14 = vmul.f32 0.1, %v1728_v23  ;;  %v1729_v45 = vadd.f32 %v2701_v24, %v3969_v27  ;;  %2646 = vmatprep.mubr.msk.bf16.mxu1 %vm1272_vm2, %v1768_v5  ;;  %2663 = vmatpush3.bf16.msra.mxu1 %v2875_v22  ;;  %v4197_v27 = vld [vmem:[#allocation24_spill] sm:$0xff] }
 0x3bd   : > { %v1747_v34 = vmul.f32 0.1, %v1731_v63  ;;  %2647 = vmatmul.mubr.msk.bf16.gmra.mrb[32].mxu1 %vm1272_vm2, %v1769_v51  ;;  %2664 = vmatprep.subr.bf16.mxu1 %v2876_v8  ;;  %v1762_v32 = vmax.f32 %v1730_v62, %v1746_v19 }
 0x3be   : > { %v1745_v3 = vmul.f32 0.1, %v1729_v45  ;;  %v1760_v25 = vmax.f32 %v1728_v23, %v1744_v14 }
 0x3bf   : > { %v1763_v49 = vmax.f32 %v1731_v63, %v1747_v34 }
 0x3c0   : > { %v1761_v4 = vmax.f32 %v1729_v45, %v1745_v3  ;;  %2665 = vmatpush3.bf16.msra.mxu1 %v2876_v8 }
 0x3c1   : > { %v1771_v42 = vpack.c.bf16 %v1763_v49, %v1762_v32  ;;  %2666 = vmatprep.subr.bf16.mxu1 %v2877_v9 }
 0x3c2   : > { %v1770_v0 = vpack.c.bf16 %v1761_v4, %v1760_v25 }
 0x3c4   : > { %2650 = vmatprep.mubr.msk.bf16.mxu1 %vm1272_vm2, %v1770_v0  ;;  %2667 = vmatpush3.bf16.msra.mxu1 %v2877_v9 }
 0x3c5   : > { %2651 = vmatmul.mubr.msk.bf16.gmra.mrb[36].mxu1 %vm1272_vm2, %v1771_v42  ;;  %2668 = vmatprep.subr.bf16.mxu1 %v2878_v58 }
 0x3c6   : > { %2670 = vmatprep.mubr.bf16.mxu1 %v4197_v27 }
 0x3c8   : > { %2669 = vmatpush3.bf16.msra.mxu1 %v2878_v58 }
 0x3cd   : > { %2671 = vmatmul.mubr.bf16.vlgmr.msra.gmra.mrb[24].mxu1 %v4198_v36 }
 0x3ce   : > { %2674 = vmatprep.mubr.bf16.mxu1 %v4199_v13 }
 0x3d5   : > { %2675 = vmatmul.mubr.bf16.gmra.mrb[28].mxu1 %v4200_v1 }
 0x3d6   : > { %2678 = vmatprep.mubr.bf16.mxu1 %v4201_v29 }
 0x3dd   : > { %2679 = vmatmul.mubr.bf16.gmra.mrb[32].mxu1 %v4202_v35 }
 0x3de   : > { %2682 = vmatprep.mubr.bf16.mxu1 %v4203_v31 }
 0x3e5   : > { %2683 = vmatmul.mubr.bf16.gmra.mrb[36].mxu1 %v4204_v38 }
 0x4a0   : > { %v2672_v37 = vpop.f32.mrb[24].mxu1 }
 0x4a1   : > { %v2095_v59 = vadd.f32 %v2672_v37, %v4011_v7  ;;  %v2023_v11 = vpop.f32.mrb[25].mxu1 }
 0x4a2   : > { %v2093_v17 = vadd.f32 %v4011_v7, %v2023_v11  ;;  %v2673_v46 = vpop.f32.mrb[26].mxu1 }
 0x4a3   : > { %v2111_v44 = vmul.f32 0.1, %v2095_v59  ;;  %v2096_v55 = vadd.f32 %v2673_v46, %v4011_v7  ;;  %v2026_v60 = vpop.f32.mrb[27].mxu1 }
 0x4a4   : > { %v2109_v39 = vmul.f32 0.1, %v2093_v17  ;;  %v2094_v40 = vadd.f32 %v4011_v7, %v2026_v60 }
 0x4a5   : > { %v2127_v15 = vmax.f32 %v2095_v59, %v2111_v44  ;;  %v2112_v50 = vmul.f32 0.1, %v2096_v55 }
 0x4a6   : > { %v2125_v52 = vmax.f32 %v2093_v17, %v2109_v39  ;;  %v2110_v56 = vmul.f32 0.1, %v2094_v40 }
 0x4a7   : > { %2143 = vst [vmem:[%s4019_s4 + $0x10] sm:$0xff] %v2127_v15  ;;  %v2128_v41 = vmax.f32 %v2096_v55, %v2112_v50 }
 0x4a8   : > { %2141 = vst [vmem:[%s4019_s4] sm:$0xff] %v2125_v52  ;;  %v2126_v16 = vmax.f32 %v2094_v40, %v2110_v56  ;;  %v2676_v30 = vpop.f32.mrb[28].mxu1 }
 0x4a9   : > { %2144 = vst [vmem:[%s4019_s4 + $0x18] sm:$0xff] %v2128_v41  ;;  %v2099_v53 = vadd.f32 %v2676_v30, %v4011_v7  ;;  %v2039_v26 = vpop.f32.mrb[29].mxu1 }
 0x4aa   : > { %2142 = vst [vmem:[%s4019_s4 + $0x8] sm:$0xff] %v2126_v16  ;;  %v2097_v61 = vadd.f32 %v4011_v7, %v2039_v26  ;;  %v2677_v21 = vpop.f32.mrb[30].mxu1 }
 0x4ab   : > { %v2115_v33 = vmul.f32 0.1, %v2099_v53  ;;  %v2100_v22 = vadd.f32 %v2677_v21, %v4011_v7  ;;  %v2042_v54 = vpop.f32.mrb[31].mxu1 }
 0x4ac   : > { %v2113_v6 = vmul.f32 0.1, %v2097_v61  ;;  %v2098_v20 = vadd.f32 %v4011_v7, %v2042_v54 }
 0x4ad   : > { %v2131_v28 = vmax.f32 %v2099_v53, %v2115_v33  ;;  %v2116_v47 = vmul.f32 0.1, %v2100_v22 }
 0x4ae   : > { %v2129_v12 = vmax.f32 %v2097_v61, %v2113_v6  ;;  %v2114_v57 = vmul.f32 0.1, %v2098_v20 }
 0x4af   : > { %2147 = vst [vmem:[%s4019_s4 + $0x30] sm:$0xff] %v2131_v28  ;;  %v2132_v48 = vmax.f32 %v2100_v22, %v2116_v47 }
 0x4b0   : > { %2145 = vst [vmem:[%s4019_s4 + $0x20] sm:$0xff] %v2129_v12  ;;  %v2130_v43 = vmax.f32 %v2098_v20, %v2114_v57  ;;  %v2680_v10 = vpop.f32.mrb[32].mxu1 }
 0x4b1   : > { %2148 = vst [vmem:[%s4019_s4 + $0x38] sm:$0xff] %v2132_v48  ;;  %v2103_v51 = vadd.f32 %v2680_v10, %v4011_v7  ;;  %v2055_v62 = vpop.f32.mrb[33].mxu1 }
 0x4b2   : > { %2146 = vst [vmem:[%s4019_s4 + $0x28] sm:$0xff] %v2130_v43  ;;  %v2101_v2 = vadd.f32 %v4011_v7, %v2055_v62  ;;  %v2681_v18 = vpop.f32.mrb[34].mxu1 }
 0x4b3   : > { %v2119_v8 = vmul.f32 0.1, %v2103_v51  ;;  %v2104_v5 = vadd.f32 %v2681_v18, %v4011_v7  ;;  %v2058_v23 = vpop.f32.mrb[35].mxu1 }
 0x4b4   : > { %v2117_v24 = vmul.f32 0.1, %v2101_v2  ;;  %v2102_v19 = vadd.f32 %v4011_v7, %v2058_v23 }
 0x4b5   : > { %v2135_v63 = vmax.f32 %v2103_v51, %v2119_v8  ;;  %v2120_v14 = vmul.f32 0.1, %v2104_v5 }
 0x4b6   : > { %v2133_v45 = vmax.f32 %v2101_v2, %v2117_v24  ;;  %v2118_v34 = vmul.f32 0.1, %v2102_v19 }
 0x4b7   : > { %2151 = vst [vmem:[%s4019_s4 + $0x50] sm:$0xff] %v2135_v63  ;;  %v2136_v9 = vmax.f32 %v2104_v5, %v2120_v14 }
 0x4b8   : > { %2149 = vst [vmem:[%s4019_s4 + $0x40] sm:$0xff] %v2133_v45  ;;  %v2134_v3 = vmax.f32 %v2102_v19, %v2118_v34  ;;  %v2684_v32 = vpop.f32.mrb[36].mxu1 }
 0x4b9   : > { %2152 = vst [vmem:[%s4019_s4 + $0x58] sm:$0xff] %v2136_v9  ;;  %v2107_v49 = vadd.f32 %v2684_v32, %v4011_v7  ;;  %v2071_v25 = vpop.f32.mrb[37].mxu1 }
 0x4ba   : > { %2150 = vst [vmem:[%s4019_s4 + $0x48] sm:$0xff] %v2134_v3  ;;  %v2105_v4 = vadd.f32 %v4011_v7, %v2071_v25  ;;  %v2685_v42 = vpop.f32.mrb[38].mxu1 }
 0x4bb   : > { %v2123_v58 = vmul.f32 0.1, %v2107_v49  ;;  %v2108_v0 = vadd.f32 %v2685_v42, %v4011_v7  ;;  %v2074_v27 = vpop.f32.mrb[39].mxu1 }
 0x4bc   : > { %v2121_v36 = vmul.f32 0.1, %v2105_v4  ;;  %v2106_v13 = vadd.f32 %v4011_v7, %v2074_v27 }
 0x4bd   : > { %v2139_v1 = vmax.f32 %v2107_v49, %v2123_v58  ;;  %v2124_v29 = vmul.f32 0.1, %v2108_v0 }
 0x4be   : > { %v2137_v35 = vmax.f32 %v2105_v4, %v2121_v36  ;;  %v2122_v31 = vmul.f32 0.1, %v2106_v13 }
 0x4bf   : > { %2155 = vst [vmem:[%s4019_s4 + $0x70] sm:$0xff] %v2139_v1  ;;  %v2140_v38 = vmax.f32 %v2108_v0, %v2124_v29 }
 0x4c0   : > { %2153 = vst [vmem:[%s4019_s4 + $0x60] sm:$0xff] %v2137_v35  ;;  %v2138_v7 = vmax.f32 %v2106_v13, %v2122_v31 }
 0x4c1   : > { %2156 = vst [vmem:[%s4019_s4 + $0x78] sm:$0xff] %v2140_v38 }
 0x4c2   : > { %2154 = vst [vmem:[%s4019_s4 + $0x68] sm:$0xff] %v2138_v7 }
 0x4c3   : > { %3032 = shalt.err (!%p3029_p0)
}
 0x4c4   : > { %s3033_s15 = scalar_lea.hbm %s4051_s23, 2048  ;;  %s3037_s21 = scalar_lea.hbm %s4206_s26, 4096 }
 0x4c5   : > { %p3034_p1 = scmp.ne.s32.totalorder %s4051_s23, %s3033_s15  ;;  %p3038_p9 = scmp.lt.u32.totalorder %s4051_s23, %s4206_s26 }
 0x4c6   : > { %p3039_p12 = scmp.lt.u32.totalorder %s3037_s21, %s3033_s15  ;;  %p3041_p2 = scmp.lt.u32.totalorder %s3033_s15, %s4051_s23 }
 0x4c7   : > { %p3035_p6 = pnand %p3034_p1, %p4207_p3 }
 0x4c8   : > { %p3040_p10 = por %p3039_p12, %p3038_p9 }
 0x4c9   : > { %p3036_p5 = pneg %p3035_p6 }
 0x4ca   : > { %p3042_p4 = por %p3041_p2, %p3040_p10 }
 0x4cc   : > { %p3043_p7 = pnand %p3042_p4, %p3036_p5 }
 0x4ce   : > { %3046 = shalt.err (!%p3043_p7)
}
 0x4cf   : > { %s3104_s27 = smov 128   ;;  %s3105_s4 = smov 8  }
 0x4d0   : > { %2762 = dma.vmem_to_hbm [thread:$0]  (%p4207_p3), %s4053_s12, 2048, %s4051_s23, %s4060_s25, %s3104_s27, %s3104_s27, %s3105_s4  }
 0x4d1 PF: > { %s4208_s8 = sld [smem:[#allocation18_spill]]  ;;  %s4209_s29 = sld [smem:[#allocation16_spill]] }
 0x4d2   : > { %s4210_s14 = sld [smem:[#allocation22_spill]] }
 0x4d7   : > { %p2794_p8 = scmp.ge.s32.totalorder %s4208_s8, 2  ;;  %s2186_s17 = sand.u32 1, %s4209_s29  }
 0x4d8   : > { %p4211_p11 = scmp.ne.s32.totalorder %s4210_s14, 0  ;;  %s2187_s19 = scalar_lea.sflag [#allocation4], %s2186_s17 }
 0x4da   : > { %p2781_p13 = pnand %p2794_p8, %p4211_p11 }
 0x4dc   : > { %3076 = dma.done.wait (!%p2781_p13), %s2187_s19, 2048  }
 0x4dd   : > { %3078 = vsyncadd (!%p2781_p13), %s2187_s19, 4294965248  ;;  %s4212_s24 = sld [smem:[#allocation19_spill]]  ;;  %s4213_s16 = sld [smem:[#allocation17_spill]] }
 0x4de   : > { %s4214_s23 = sld [smem:[#allocation20_spill]]  ;;  %s4215_s21 = smov %s3085_s22 }
 0x4e3   : > { %p25_p0 = scmp.ge.s32.totalorder %s4212_s24, 4   ;;  %s4216_s22 = smov %s4213_s16 }
 0x4e5   :  { %27 = sbr.rel (!%p25_p0) target bundleno = 10 (0xa), region = 126 }
 0x4ec   :  { %2192 = vsyncpa [#allocation3], 1 }
 0x4ed   :  { %2194 = vsyncpa [#allocation3 + $0x1], 1 }
 0x4ee   :  { %2195 = vsyncpa [#allocation6], 1 }
 0x4ef   :  { %2196 = vsyncpa [#allocation9], 1 }
 0x4f0   :  { %2197 = vsyncpa [#allocation4], 1 }
 0x4f1   :  { %2199 = vsyncpa [#allocation4 + $0x1], 1 }

</bundles_post_ra>
